<compile_context>
chip_gen: v6e
topology: v6e:2x2x1
jax: 0.10.0
libtpu: 0.0.40
codegen_flags: <defaults>
</compile_context>

<pallas_src>
import functools

import jax
import jax.numpy as jnp
from jax.experimental import pallas as pl
from jax.experimental.pallas import tpu as pltpu

# ----------------------- config (mirrors args / BertConfig) -----------------------
HIDDEN = 32                 # args.hidden_size
NUM_LAYERS = 2              # args.num_hidden_layers
NUM_HEADS = 4               # LM attention heads (graph conv layers use 1 head)
NUM_SAMPLED_EVIDENCE = 2    # args.num_sampled_evidence
NUM_SAMPLED_REFERENCES = 2  # args.num_sampled_references
FFN_MULT = 4
LN_EPS = 1e-12
GELU_C = 0.7978845608028654  # sqrt(2/pi)


# ================================ Pallas kernels ================================

def _bert_layer_kernel(x_ref, m_ref,
                       wqkv_ref, bqkv_ref, wo_ref, bo_ref,
                       ln1g_ref, ln1b_ref,
                       w1_ref, b1_ref, w2_ref, b2_ref,
                       ln2g_ref, ln2b_ref,
                       o_ref, *, num_heads):
    """One fully-fused BERT encoder layer for a single batch element."""
    x = x_ref[0]                                   # (S, H)
    S, Hd = x.shape
    dh = Hd // num_heads
    scale = 1.0 / float(dh) ** 0.5

    # ---- packed QKV projection: one MXU pass of (S,H) x (H,3H) ----
    qkv = (jnp.dot(x, wqkv_ref[...], preferred_element_type=jnp.float32)
           + bqkv_ref[...])                        # (S, 3H)
    mask = m_ref[0]                                # (1, S) additive over keys

    # ---- multi-head attention; concat over heads is folded into the output
    # dense: sum_h (softmax(q_h k_h^T) v_h) @ Wo[h*dh:(h+1)*dh, :] ----
    acc = jnp.zeros((S, Hd), jnp.float32)
    for h in range(num_heads):                     # static unrolled head loop
        qh = qkv[:, h * dh:(h + 1) * dh]
        kh = qkv[:, Hd + h * dh:Hd + (h + 1) * dh]
        vh = qkv[:, 2 * Hd + h * dh:2 * Hd + (h + 1) * dh]
        sc = jax.lax.dot_general(qh, kh, (((1,), (1,)), ((), ())),
                                 preferred_element_type=jnp.float32) * scale
        sc = sc + mask
        sc = sc - jnp.max(sc, axis=-1, keepdims=True)
        p = jnp.exp(sc)
        p = p * pl.reciprocal(jnp.sum(p, axis=-1, keepdims=True), approx=True)
        ctx_h = jnp.dot(p, vh, preferred_element_type=jnp.float32)   # (S, dh)
        acc = acc + jnp.dot(ctx_h, wo_ref[h * dh:(h + 1) * dh, :],
                            preferred_element_type=jnp.float32)
    a = acc + bo_ref[...]

    # ---- add & LayerNorm 1 ----
    y = a + x
    mu = jnp.mean(y, axis=-1, keepdims=True)
    var = jnp.mean(jnp.square(y - mu), axis=-1, keepdims=True)
    h1 = (y - mu) * jax.lax.rsqrt(var + LN_EPS) * ln1g_ref[...] + ln1b_ref[...]

    # ---- FFN (GELU) ----
    f = (jnp.dot(h1, w1_ref[...], preferred_element_type=jnp.float32)
         + b1_ref[...])
    # TODO(synk): HF BERT uses the exact erf-based GELU; tanh approximation used here.
    g = 0.5 * f * (1.0 + jnp.tanh(GELU_C * (f + 0.044715 * f * f * f)))
    f2 = (jnp.dot(g, w2_ref[...], preferred_element_type=jnp.float32)
          + b2_ref[...])

    # ---- add & LayerNorm 2 ----
    y2 = f2 + h1
    mu2 = jnp.mean(y2, axis=-1, keepdims=True)
    var2 = jnp.mean(jnp.square(y2 - mu2), axis=-1, keepdims=True)
    o_ref[0] = ((y2 - mu2) * jax.lax.rsqrt(var2 + LN_EPS)
                * ln2g_ref[...] + ln2b_ref[...])


def _graph_attn_kernel(x_ref, wqkv_ref, bqkv_ref, o_ref):
    """1-head BertSelfAttention (no attention mask) for one batch element."""
    x = x_ref[0]                                   # (S, H)
    S, Hd = x.shape
    scale = 1.0 / float(Hd) ** 0.5
    qkv = (jnp.dot(x, wqkv_ref[...], preferred_element_type=jnp.float32)
           + bqkv_ref[...])                        # (S, 3H)
    q = qkv[:, :Hd]
    k = qkv[:, Hd:2 * Hd]
    v = qkv[:, 2 * Hd:]
    sc = jax.lax.dot_general(q, k, (((1,), (1,)), ((), ())),
                             preferred_element_type=jnp.float32) * scale
    sc = sc - jnp.max(sc, axis=-1, keepdims=True)
    p = jnp.exp(sc)
    p = p * pl.reciprocal(jnp.sum(p, axis=-1, keepdims=True), approx=True)
    o_ref[0] = jnp.dot(p, v, preferred_element_type=jnp.float32)


# ================================ kernel wrappers ================================

def bert_layer(p, x, mask, num_heads=NUM_HEADS):
    """One lm.encoder.layer[i] applied to x: (B, S, H), mask: (B, 1, S)."""
    B, S, Hd = x.shape
    F = p["w1"].shape[1]
    kern = functools.partial(_bert_layer_kernel, num_heads=num_heads)
    return pl.pallas_call(
        kern,
        out_shape=jax.ShapeDtypeStruct((B, S, Hd), jnp.float32),
        grid=(B,),
        in_specs=[
            pl.BlockSpec((1, S, Hd), lambda b: (b, 0, 0)),
            pl.BlockSpec((1, 1, S), lambda b: (b, 0, 0)),
            pl.BlockSpec((Hd, 3 * Hd), lambda b: (0, 0)),
            pl.BlockSpec((1, 3 * Hd), lambda b: (0, 0)),
            pl.BlockSpec((Hd, Hd), lambda b: (0, 0)),
            pl.BlockSpec((1, Hd), lambda b: (0, 0)),
            pl.BlockSpec((1, Hd), lambda b: (0, 0)),
            pl.BlockSpec((1, Hd), lambda b: (0, 0)),
            pl.BlockSpec((Hd, F), lambda b: (0, 0)),
            pl.BlockSpec((1, F), lambda b: (0, 0)),
            pl.BlockSpec((F, Hd), lambda b: (0, 0)),
            pl.BlockSpec((1, Hd), lambda b: (0, 0)),
            pl.BlockSpec((1, Hd), lambda b: (0, 0)),
            pl.BlockSpec((1, Hd), lambda b: (0, 0)),
        ],
        out_specs=pl.BlockSpec((1, S, Hd), lambda b: (b, 0, 0)),
        compiler_params=pltpu.CompilerParams(dimension_semantics=("parallel",)),
    )(x, mask, p["wqkv"], p["bqkv"], p["wo"], p["bo"],
      p["ln1_g"], p["ln1_b"], p["w1"], p["b1"], p["w2"], p["b2"],
      p["ln2_g"], p["ln2_b"])


def graph_attention(p, x):
    """graph_conv_layers[k]: 1-head BertSelfAttention, no attention mask."""
    B, S, Hd = x.shape
    return pl.pallas_call(
        _graph_attn_kernel,
        out_shape=jax.ShapeDtypeStruct((B, S, Hd), jnp.float32),
        grid=(B,),
        in_specs=[
            pl.BlockSpec((1, S, Hd), lambda b: (b, 0, 0)),
            pl.BlockSpec((Hd, 3 * Hd), lambda b: (0, 0)),
            pl.BlockSpec((1, 3 * Hd), lambda b: (0, 0)),
        ],
        out_specs=pl.BlockSpec((1, S, Hd), lambda b: (b, 0, 0)),
        compiler_params=pltpu.CompilerParams(dimension_semantics=("parallel",)),
    )(x, p["wqkv"], p["bqkv"])


# ============================ EncoderLayer.forward ============================

def encoder_forward(lm_params, graph_params, hidden_states, attention_mask,
                    ctx_hidden_states, ctx_attention_mask,
                    ref_hidden_states, ref_attention_mask,
                    claim_or_evid, mode):
    del mode  # unused, as in the reference module
    H = HIDDEN
    all_hidden_states = ()
    for layer_id in range(NUM_LAYERS):
        p = lm_params[layer_id]
        if layer_id > 0:
            cls_emb = hidden_states[:, 3, :]
            mask_main = attention_mask
            if claim_or_evid == "evid":
                cls_emb_reshape = cls_emb.reshape(-1, NUM_SAMPLED_EVIDENCE, H)
                cls_emb_agg = graph_attention(graph_params[0],
                                              cls_emb_reshape).reshape(-1, H)
                hidden_states = hidden_states.at[:, 0, :].set(cls_emb_agg)
            elif claim_or_evid == "claim":
                mask_main = mask_main.at[:, :, :3].set(-10000.0)
            if ctx_hidden_states is not None:
                ctx_cls_emb = ctx_hidden_states[:, 3, :]
                self_and_ctx = jnp.concatenate(
                    [cls_emb[:, None, :], ctx_cls_emb[:, None, :]], axis=1)
                ctx_cls_agg = graph_attention(graph_params[1], self_and_ctx)[:, 0, :]
                hidden_states = hidden_states.at[:, 1, :].set(ctx_cls_agg)
            if ref_hidden_states is not None:
                ref_cls = ref_hidden_states[:, 3, :].reshape(
                    -1, NUM_SAMPLED_REFERENCES, H)
                self_and_ref = jnp.concatenate([cls_emb[:, None, :], ref_cls], axis=1)
                ref_cls_agg = graph_attention(graph_params[2], self_and_ref)[:, 0, :]
                hidden_states = hidden_states.at[:, 2, :].set(ref_cls_agg)
            # PyTorch appends hidden_states then mutates it in place, so the stored
            # tuple entry aliases the CLS-slot updates -> append the updated tensor.
            all_hidden_states = all_hidden_states + (hidden_states,)
        else:
            all_hidden_states = all_hidden_states + (hidden_states,)
            # layer 0 masks the first 3 key slots unconditionally (as in PyTorch).
            mask_main = attention_mask.at[:, :, :3].set(-10000.0)

        # main / ctx / ref streams share lm.encoder.layer[layer_id]; batch them
        # into ONE fused-layer pallas_call and split the result afterwards.
        streams, masks, sizes = [hidden_states], [mask_main], [hidden_states.shape[0]]
        if ctx_hidden_states is not None:
            streams.append(ctx_hidden_states)
            masks.append(ctx_attention_mask)
            sizes.append(ctx_hidden_states.shape[0])
        if ref_hidden_states is not None:
            streams.append(ref_hidden_states)
            masks.append(ref_attention_mask)
            sizes.append(ref_hidden_states.shape[0])
        x_cat = jnp.concatenate(streams, axis=0)
        m_cat = jnp.concatenate(masks, axis=0)
        out_cat = bert_layer(p, x_cat, m_cat)

        off = 0
        outs = []
        for sz in sizes:
            outs.append(out_cat[off:off + sz])
            off += sz
        hidden_states = outs[0]
        idx = 1
        if ctx_hidden_states is not None:
            ctx_hidden_states = outs[idx]
            idx += 1
        if ref_hidden_states is not None:
            ref_hidden_states = outs[idx]
            idx += 1
    all_hidden_states = all_hidden_states + (hidden_states,)
    return all_hidden_states


encoder_forward_jit = jax.jit(encoder_forward,
                              static_argnames=("claim_or_evid", "mode"))


# ============================ deterministic param init ============================

def _dense_params(key, din, dout):
    w = jax.random.normal(key, (din, dout), jnp.float32) * 0.02
    b = jnp.zeros((1, dout), jnp.float32)
    return w, b


def init_attn_params(key):
    p = {}
    p["wqkv"], p["bqkv"] = _dense_params(key, HIDDEN, 3 * HIDDEN)
    return p


def init_bert_layer(key):
    ka, ko, k1, k2 = jax.random.split(key, 4)
    p = init_attn_params(ka)
    p["wo"], p["bo"] = _dense_params(ko, HIDDEN, HIDDEN)
    p["w1"], p["b1"] = _dense_params(k1, HIDDEN, FFN_MULT * HIDDEN)
    p["w2"], p["b2"] = _dense_params(k2, FFN_MULT * HIDDEN, HIDDEN)
    p["ln1_g"] = jnp.ones((1, HIDDEN), jnp.float32)
    p["ln1_b"] = jnp.zeros((1, HIDDEN), jnp.float32)
    p["ln2_g"] = jnp.ones((1, HIDDEN), jnp.float32)
    p["ln2_b"] = jnp.zeros((1, HIDDEN), jnp.float32)
    return p


# ==================================== main ====================================

if __name__ == "__main__":
    key = jax.random.PRNGKey(0)
    B, S = 4, 8                                   # B divisible by NUM_SAMPLED_EVIDENCE
    kx, kc, kr, kl, kg = jax.random.split(key, 5)

    hidden_states = jax.random.normal(kx, (B, S, HIDDEN), jnp.float32)
    ctx_hidden_states = jax.random.normal(kc, (B, S, HIDDEN), jnp.float32)
    ref_hidden_states = jax.random.normal(
        kr, (B * NUM_SAMPLED_REFERENCES, S, HIDDEN), jnp.float32)

    attention_mask = jnp.zeros((B, 1, S), jnp.float32)          # additive ext. mask
    ctx_attention_mask = jnp.zeros((B, 1, S), jnp.float32)
    ref_attention_mask = jnp.zeros((B * NUM_SAMPLED_REFERENCES, 1, S), jnp.float32)

    lm_params = [init_bert_layer(k) for k in jax.random.split(kl, NUM_LAYERS)]
    graph_params = [init_attn_params(k) for k in jax.random.split(kg, 3)]

    outs = encoder_forward_jit(lm_params, graph_params,
                               hidden_states, attention_mask,
                               ctx_hidden_states, ctx_attention_mask,
                               ref_hidden_states, ref_attention_mask,
                               claim_or_evid="evid", mode="train")

    for o in outs:
        jax.block_until_ready(o)
    assert len(outs) == NUM_LAYERS + 1
    assert all(o.shape == (B, S, HIDDEN) for o in outs)
    print("KERNEL_OK")
</pallas_src>

<mosaic_0001>
module attributes {stable_mosaic.version = 11 : i64} {
  func.func @_bert_layer_kernel(%arg0: i32, %arg1: memref<1x8x32xf32, #tpu.memory_space<vmem>>, %arg2: memref<1x1x8xf32, #tpu.memory_space<vmem>>, %arg3: memref<32x96xf32, #tpu.memory_space<vmem>>, %arg4: memref<1x96xf32, #tpu.memory_space<vmem>>, %arg5: memref<32x32xf32, #tpu.memory_space<vmem>>, %arg6: memref<1x32xf32, #tpu.memory_space<vmem>>, %arg7: memref<1x32xf32, #tpu.memory_space<vmem>>, %arg8: memref<1x32xf32, #tpu.memory_space<vmem>>, %arg9: memref<32x128xf32, #tpu.memory_space<vmem>>, %arg10: memref<1x128xf32, #tpu.memory_space<vmem>>, %arg11: memref<128x32xf32, #tpu.memory_space<vmem>>, %arg12: memref<1x32xf32, #tpu.memory_space<vmem>>, %arg13: memref<1x32xf32, #tpu.memory_space<vmem>>, %arg14: memref<1x32xf32, #tpu.memory_space<vmem>>, %arg15: memref<1x8x32xf32, #tpu.memory_space<vmem>>) attributes {dimension_semantics = [#tpu.dimension_semantics<parallel>], iteration_bounds = array<i64: 16>, scalar_prefetch = 0 : i64, scratch_operands = 0 : i64, tpu.core_type = #tpu.core_type<tc>, window_params = [{transform_indices = @transform_0, window_bounds = array<i64: 1, 8, 32>}, {transform_indices = @transform_1, window_bounds = array<i64: 1, 1, 8>}, {pipeline_mode = #tpu.pipeline_mode<synchronous>, transform_indices = @transform_2, window_bounds = array<i64: 32, 96>}, {pipeline_mode = #tpu.pipeline_mode<synchronous>, transform_indices = @transform_3, window_bounds = array<i64: 1, 96>}, {pipeline_mode = #tpu.pipeline_mode<synchronous>, transform_indices = @transform_4, window_bounds = array<i64: 32, 32>}, {pipeline_mode = #tpu.pipeline_mode<synchronous>, transform_indices = @transform_5, window_bounds = array<i64: 1, 32>}, {pipeline_mode = #tpu.pipeline_mode<synchronous>, transform_indices = @transform_6, window_bounds = array<i64: 1, 32>}, {pipeline_mode = #tpu.pipeline_mode<synchronous>, transform_indices = @transform_7, window_bounds = array<i64: 1, 32>}, {pipeline_mode = #tpu.pipeline_mode<synchronous>, transform_indices = @transform_8, window_bounds = array<i64: 32, 128>}, {pipeline_mode = #tpu.pipeline_mode<synchronous>, transform_indices = @transform_9, window_bounds = array<i64: 1, 128>}, {pipeline_mode = #tpu.pipeline_mode<synchronous>, transform_indices = @transform_10, window_bounds = array<i64: 128, 32>}, {pipeline_mode = #tpu.pipeline_mode<synchronous>, transform_indices = @transform_11, window_bounds = array<i64: 1, 32>}, {pipeline_mode = #tpu.pipeline_mode<synchronous>, transform_indices = @transform_12, window_bounds = array<i64: 1, 32>}, {pipeline_mode = #tpu.pipeline_mode<synchronous>, transform_indices = @transform_13, window_bounds = array<i64: 1, 32>}, {transform_indices = @transform_14, window_bounds = array<i64: 1, 8, 32>}]} {
    %c0 = arith.constant 0 : index
    %c0_0 = arith.constant 0 : index
    %c0_1 = arith.constant 0 : index
    %0 = vector.load %arg1[%c0, %c0_0, %c0_1] : memref<1x8x32xf32, #tpu.memory_space<vmem>>, vector<1x8x32xf32>
    %1 = vector.shape_cast %0 : vector<1x8x32xf32> to vector<8x32xf32>
    %c0_2 = arith.constant 0 : index
    %c0_3 = arith.constant 0 : index
    %2 = vector.load %arg3[%c0_2, %c0_3] : memref<32x96xf32, #tpu.memory_space<vmem>>, vector<32x96xf32>
    %cst = arith.constant dense<0.000000e+00> : vector<8x96xf32>
    %3 = tpu.matmul %1, %2, %cst {dimension_numbers = #tpu.dot_dimension_numbers<[1], [0], [0], [1], [0, 0, 1, 1], [], []>} : vector<8x32xf32>, vector<32x96xf32>, vector<8x96xf32> -> vector<8x96xf32>
    %c0_4 = arith.constant 0 : index
    %c0_5 = arith.constant 0 : index
    %4 = vector.load %arg4[%c0_4, %c0_5] : memref<1x96xf32, #tpu.memory_space<vmem>>, vector<1x96xf32>
    %5 = vector.broadcast %4 : vector<1x96xf32> to vector<8x96xf32>
    %6 = arith.addf %3, %5 : vector<8x96xf32>
    %c0_6 = arith.constant 0 : index
    %c0_7 = arith.constant 0 : index
    %c0_8 = arith.constant 0 : index
    %7 = vector.load %arg2[%c0_6, %c0_7, %c0_8] : memref<1x1x8xf32, #tpu.memory_space<vmem>>, vector<1x1x8xf32>
    %8 = vector.shape_cast %7 : vector<1x1x8xf32> to vector<1x8xf32>
    %cst_9 = arith.constant 0.000000e+00 : f32
    %9 = vector.broadcast %cst_9 : f32 to vector<8x32xf32>
    %10 = vector.extract_strided_slice %6 {offsets = [0, 0], sizes = [8, 8], strides = [1, 1]} : vector<8x96xf32> to vector<8x8xf32>
    %11 = vector.extract_strided_slice %6 {offsets = [0, 32], sizes = [8, 8], strides = [1, 1]} : vector<8x96xf32> to vector<8x8xf32>
    %12 = vector.extract_strided_slice %6 {offsets = [0, 64], sizes = [8, 8], strides = [1, 1]} : vector<8x96xf32> to vector<8x8xf32>
    %cst_10 = arith.constant dense<0.000000e+00> : vector<8x8xf32>
    %13 = tpu.matmul %10, %11, %cst_10 {dimension_numbers = #tpu.dot_dimension_numbers<[1], [1], [0], [0], [0, 0, 1, 0], [], []>} : vector<8x8xf32>, vector<8x8xf32>, vector<8x8xf32> -> vector<8x8xf32>
    %cst_11 = arith.constant 0.353553385 : f32
    %14 = vector.broadcast %cst_11 : f32 to vector<8x8xf32>
    %15 = arith.mulf %13, %14 : vector<8x8xf32>
    %16 = vector.broadcast %8 : vector<1x8xf32> to vector<8x8xf32>
    %17 = arith.addf %15, %16 : vector<8x8xf32>
    %cst_12 = arith.constant dense<0xFF800000> : vector<8xf32>
    %18 = vector.multi_reduction <maximumf>, %17, %cst_12 [1] : vector<8x8xf32> to vector<8xf32>
    %19 = vector.shape_cast %18 : vector<8xf32> to vector<8x1xf32>
    %20 = vector.broadcast %19 : vector<8x1xf32> to vector<8x8xf32>
    %21 = arith.subf %17, %20 : vector<8x8xf32>
    %22 = math.exp %21 : vector<8x8xf32>
    %cst_13 = arith.constant dense<0.000000e+00> : vector<8xf32>
    %23 = vector.multi_reduction <add>, %22, %cst_13 [1] : vector<8x8xf32> to vector<8xf32>
    %24 = vector.shape_cast %23 : vector<8xf32> to vector<8x1xf32>
    %25 = tpu.reciprocal %24 {approx = true} : vector<8x1xf32> -> vector<8x1xf32>
    %26 = vector.broadcast %25 : vector<8x1xf32> to vector<8x8xf32>
    %27 = arith.mulf %22, %26 : vector<8x8xf32>
    %cst_14 = arith.constant dense<0.000000e+00> : vector<8x8xf32>
    %28 = tpu.matmul %27, %12, %cst_14 {dimension_numbers = #tpu.dot_dimension_numbers<[1], [0], [0], [1], [0, 0, 1, 1], [], []>} : vector<8x8xf32>, vector<8x8xf32>, vector<8x8xf32> -> vector<8x8xf32>
    %c0_15 = arith.constant 0 : index
    %c0_16 = arith.constant 0 : index
    %29 = vector.load %arg5[%c0_15, %c0_16] : memref<32x32xf32, #tpu.memory_space<vmem>>, vector<8x32xf32>
    %cst_17 = arith.constant dense<0.000000e+00> : vector<8x32xf32>
    %30 = tpu.matmul %28, %29, %cst_17 {dimension_numbers = #tpu.dot_dimension_numbers<[1], [0], [0], [1], [0, 0, 1, 1], [], []>} : vector<8x8xf32>, vector<8x32xf32>, vector<8x32xf32> -> vector<8x32xf32>
    %31 = arith.addf %9, %30 : vector<8x32xf32>
    %32 = vector.extract_strided_slice %6 {offsets = [0, 8], sizes = [8, 8], strides = [1, 1]} : vector<8x96xf32> to vector<8x8xf32>
    %33 = vector.extract_strided_slice %6 {offsets = [0, 40], sizes = [8, 8], strides = [1, 1]} : vector<8x96xf32> to vector<8x8xf32>
    %34 = vector.extract_strided_slice %6 {offsets = [0, 72], sizes = [8, 8], strides = [1, 1]} : vector<8x96xf32> to vector<8x8xf32>
    %cst_18 = arith.constant dense<0.000000e+00> : vector<8x8xf32>
    %35 = tpu.matmul %32, %33, %cst_18 {dimension_numbers = #tpu.dot_dimension_numbers<[1], [1], [0], [0], [0, 0, 1, 0], [], []>} : vector<8x8xf32>, vector<8x8xf32>, vector<8x8xf32> -> vector<8x8xf32>
    %cst_19 = arith.constant 0.353553385 : f32
    %36 = vector.broadcast %cst_19 : f32 to vector<8x8xf32>
    %37 = arith.mulf %35, %36 : vector<8x8xf32>
    %38 = vector.broadcast %8 : vector<1x8xf32> to vector<8x8xf32>
    %39 = arith.addf %37, %38 : vector<8x8xf32>
    %cst_20 = arith.constant dense<0xFF800000> : vector<8xf32>
    %40 = vector.multi_reduction <maximumf>, %39, %cst_20 [1] : vector<8x8xf32> to vector<8xf32>
    %41 = vector.shape_cast %40 : vector<8xf32> to vector<8x1xf32>
    %42 = vector.broadcast %41 : vector<8x1xf32> to vector<8x8xf32>
    %43 = arith.subf %39, %42 : vector<8x8xf32>
    %44 = math.exp %43 : vector<8x8xf32>
    %cst_21 = arith.constant dense<0.000000e+00> : vector<8xf32>
    %45 = vector.multi_reduction <add>, %44, %cst_21 [1] : vector<8x8xf32> to vector<8xf32>
    %46 = vector.shape_cast %45 : vector<8xf32> to vector<8x1xf32>
    %47 = tpu.reciprocal %46 {approx = true} : vector<8x1xf32> -> vector<8x1xf32>
    %48 = vector.broadcast %47 : vector<8x1xf32> to vector<8x8xf32>
    %49 = arith.mulf %44, %48 : vector<8x8xf32>
    %cst_22 = arith.constant dense<0.000000e+00> : vector<8x8xf32>
    %50 = tpu.matmul %49, %34, %cst_22 {dimension_numbers = #tpu.dot_dimension_numbers<[1], [0], [0], [1], [0, 0, 1, 1], [], []>} : vector<8x8xf32>, vector<8x8xf32>, vector<8x8xf32> -> vector<8x8xf32>
    %c8 = arith.constant 8 : index
    %c0_23 = arith.constant 0 : index
    %51 = vector.load %arg5[%c8, %c0_23] : memref<32x32xf32, #tpu.memory_space<vmem>>, vector<8x32xf32>
    %cst_24 = arith.constant dense<0.000000e+00> : vector<8x32xf32>
    %52 = tpu.matmul %50, %51, %cst_24 {dimension_numbers = #tpu.dot_dimension_numbers<[1], [0], [0], [1], [0, 0, 1, 1], [], []>} : vector<8x8xf32>, vector<8x32xf32>, vector<8x32xf32> -> vector<8x32xf32>
    %53 = arith.addf %31, %52 : vector<8x32xf32>
    %54 = vector.extract_strided_slice %6 {offsets = [0, 16], sizes = [8, 8], strides = [1, 1]} : vector<8x96xf32> to vector<8x8xf32>
    %55 = vector.extract_strided_slice %6 {offsets = [0, 48], sizes = [8, 8], strides = [1, 1]} : vector<8x96xf32> to vector<8x8xf32>
    %56 = vector.extract_strided_slice %6 {offsets = [0, 80], sizes = [8, 8], strides = [1, 1]} : vector<8x96xf32> to vector<8x8xf32>
    %cst_25 = arith.constant dense<0.000000e+00> : vector<8x8xf32>
    %57 = tpu.matmul %54, %55, %cst_25 {dimension_numbers = #tpu.dot_dimension_numbers<[1], [1], [0], [0], [0, 0, 1, 0], [], []>} : vector<8x8xf32>, vector<8x8xf32>, vector<8x8xf32> -> vector<8x8xf32>
    %cst_26 = arith.constant 0.353553385 : f32
    %58 = vector.broadcast %cst_26 : f32 to vector<8x8xf32>
    %59 = arith.mulf %57, %58 : vector<8x8xf32>
    %60 = vector.broadcast %8 : vector<1x8xf32> to vector<8x8xf32>
    %61 = arith.addf %59, %60 : vector<8x8xf32>
    %cst_27 = arith.constant dense<0xFF800000> : vector<8xf32>
    %62 = vector.multi_reduction <maximumf>, %61, %cst_27 [1] : vector<8x8xf32> to vector<8xf32>
    %63 = vector.shape_cast %62 : vector<8xf32> to vector<8x1xf32>
    %64 = vector.broadcast %63 : vector<8x1xf32> to vector<8x8xf32>
    %65 = arith.subf %61, %64 : vector<8x8xf32>
    %66 = math.exp %65 : vector<8x8xf32>
    %cst_28 = arith.constant dense<0.000000e+00> : vector<8xf32>
    %67 = vector.multi_reduction <add>, %66, %cst_28 [1] : vector<8x8xf32> to vector<8xf32>
    %68 = vector.shape_cast %67 : vector<8xf32> to vector<8x1xf32>
    %69 = tpu.reciprocal %68 {approx = true} : vector<8x1xf32> -> vector<8x1xf32>
    %70 = vector.broadcast %69 : vector<8x1xf32> to vector<8x8xf32>
    %71 = arith.mulf %66, %70 : vector<8x8xf32>
    %cst_29 = arith.constant dense<0.000000e+00> : vector<8x8xf32>
    %72 = tpu.matmul %71, %56, %cst_29 {dimension_numbers = #tpu.dot_dimension_numbers<[1], [0], [0], [1], [0, 0, 1, 1], [], []>} : vector<8x8xf32>, vector<8x8xf32>, vector<8x8xf32> -> vector<8x8xf32>
    %c16 = arith.constant 16 : index
    %c0_30 = arith.constant 0 : index
    %73 = vector.load %arg5[%c16, %c0_30] : memref<32x32xf32, #tpu.memory_space<vmem>>, vector<8x32xf32>
    %cst_31 = arith.constant dense<0.000000e+00> : vector<8x32xf32>
    %74 = tpu.matmul %72, %73, %cst_31 {dimension_numbers = #tpu.dot_dimension_numbers<[1], [0], [0], [1], [0, 0, 1, 1], [], []>} : vector<8x8xf32>, vector<8x32xf32>, vector<8x32xf32> -> vector<8x32xf32>
    %75 = arith.addf %53, %74 : vector<8x32xf32>
    %76 = vector.extract_strided_slice %6 {offsets = [0, 24], sizes = [8, 8], strides = [1, 1]} : vector<8x96xf32> to vector<8x8xf32>
    %77 = vector.extract_strided_slice %6 {offsets = [0, 56], sizes = [8, 8], strides = [1, 1]} : vector<8x96xf32> to vector<8x8xf32>
    %78 = vector.extract_strided_slice %6 {offsets = [0, 88], sizes = [8, 8], strides = [1, 1]} : vector<8x96xf32> to vector<8x8xf32>
    %cst_32 = arith.constant dense<0.000000e+00> : vector<8x8xf32>
    %79 = tpu.matmul %76, %77, %cst_32 {dimension_numbers = #tpu.dot_dimension_numbers<[1], [1], [0], [0], [0, 0, 1, 0], [], []>} : vector<8x8xf32>, vector<8x8xf32>, vector<8x8xf32> -> vector<8x8xf32>
    %cst_33 = arith.constant 0.353553385 : f32
    %80 = vector.broadcast %cst_33 : f32 to vector<8x8xf32>
    %81 = arith.mulf %79, %80 : vector<8x8xf32>
    %82 = vector.broadcast %8 : vector<1x8xf32> to vector<8x8xf32>
    %83 = arith.addf %81, %82 : vector<8x8xf32>
    %cst_34 = arith.constant dense<0xFF800000> : vector<8xf32>
    %84 = vector.multi_reduction <maximumf>, %83, %cst_34 [1] : vector<8x8xf32> to vector<8xf32>
    %85 = vector.shape_cast %84 : vector<8xf32> to vector<8x1xf32>
    %86 = vector.broadcast %85 : vector<8x1xf32> to vector<8x8xf32>
    %87 = arith.subf %83, %86 : vector<8x8xf32>
    %88 = math.exp %87 : vector<8x8xf32>
    %cst_35 = arith.constant dense<0.000000e+00> : vector<8xf32>
    %89 = vector.multi_reduction <add>, %88, %cst_35 [1] : vector<8x8xf32> to vector<8xf32>
    %90 = vector.shape_cast %89 : vector<8xf32> to vector<8x1xf32>
    %91 = tpu.reciprocal %90 {approx = true} : vector<8x1xf32> -> vector<8x1xf32>
    %92 = vector.broadcast %91 : vector<8x1xf32> to vector<8x8xf32>
    %93 = arith.mulf %88, %92 : vector<8x8xf32>
    %cst_36 = arith.constant dense<0.000000e+00> : vector<8x8xf32>
    %94 = tpu.matmul %93, %78, %cst_36 {dimension_numbers = #tpu.dot_dimension_numbers<[1], [0], [0], [1], [0, 0, 1, 1], [], []>} : vector<8x8xf32>, vector<8x8xf32>, vector<8x8xf32> -> vector<8x8xf32>
    %c24 = arith.constant 24 : index
    %c0_37 = arith.constant 0 : index
    %95 = vector.load %arg5[%c24, %c0_37] : memref<32x32xf32, #tpu.memory_space<vmem>>, vector<8x32xf32>
    %cst_38 = arith.constant dense<0.000000e+00> : vector<8x32xf32>
    %96 = tpu.matmul %94, %95, %cst_38 {dimension_numbers = #tpu.dot_dimension_numbers<[1], [0], [0], [1], [0, 0, 1, 1], [], []>} : vector<8x8xf32>, vector<8x32xf32>, vector<8x32xf32> -> vector<8x32xf32>
    %97 = arith.addf %75, %96 : vector<8x32xf32>
    %c0_39 = arith.constant 0 : index
    %c0_40 = arith.constant 0 : index
    %98 = vector.load %arg6[%c0_39, %c0_40] : memref<1x32xf32, #tpu.memory_space<vmem>>, vector<1x32xf32>
    %99 = vector.broadcast %98 : vector<1x32xf32> to vector<8x32xf32>
    %100 = arith.addf %97, %99 : vector<8x32xf32>
    %101 = arith.addf %100, %1 : vector<8x32xf32>
    %cst_41 = arith.constant dense<0.000000e+00> : vector<8xf32>
    %102 = vector.multi_reduction <add>, %101, %cst_41 [1] : vector<8x32xf32> to vector<8xf32>
    %103 = vector.shape_cast %102 : vector<8xf32> to vector<8x1xf32>
    %cst_42 = arith.constant 3.200000e+01 : f32
    %104 = vector.broadcast %cst_42 : f32 to vector<8x1xf32>
    %105 = arith.divf %103, %104 : vector<8x1xf32>
    %106 = vector.broadcast %105 : vector<8x1xf32> to vector<8x32xf32>
    %107 = arith.subf %101, %106 : vector<8x32xf32>
    %108 = arith.mulf %107, %107 : vector<8x32xf32>
    %cst_43 = arith.constant dense<0.000000e+00> : vector<8xf32>
    %109 = vector.multi_reduction <add>, %108, %cst_43 [1] : vector<8x32xf32> to vector<8xf32>
    %110 = vector.shape_cast %109 : vector<8xf32> to vector<8x1xf32>
    %cst_44 = arith.constant 3.200000e+01 : f32
    %111 = vector.broadcast %cst_44 : f32 to vector<8x1xf32>
    %112 = arith.divf %110, %111 : vector<8x1xf32>
    %113 = vector.broadcast %105 : vector<8x1xf32> to vector<8x32xf32>
    %114 = arith.subf %101, %113 : vector<8x32xf32>
    %cst_45 = arith.constant 9.99999996E-13 : f32
    %115 = vector.broadcast %cst_45 : f32 to vector<8x1xf32>
    %116 = arith.addf %112, %115 : vector<8x1xf32>
    %117 = math.rsqrt %116 : vector<8x1xf32>
    %118 = vector.broadcast %117 : vector<8x1xf32> to vector<8x32xf32>
    %119 = arith.mulf %114, %118 : vector<8x32xf32>
    %c0_46 = arith.constant 0 : index
    %c0_47 = arith.constant 0 : index
    %120 = vector.load %arg7[%c0_46, %c0_47] : memref<1x32xf32, #tpu.memory_space<vmem>>, vector<1x32xf32>
    %121 = vector.broadcast %120 : vector<1x32xf32> to vector<8x32xf32>
    %122 = arith.mulf %119, %121 : vector<8x32xf32>
    %c0_48 = arith.constant 0 : index
    %c0_49 = arith.constant 0 : index
    %123 = vector.load %arg8[%c0_48, %c0_49] : memref<1x32xf32, #tpu.memory_space<vmem>>, vector<1x32xf32>
    %124 = vector.broadcast %123 : vector<1x32xf32> to vector<8x32xf32>
    %125 = arith.addf %122, %124 : vector<8x32xf32>
    %c0_50 = arith.constant 0 : index
    %c0_51 = arith.constant 0 : index
    %126 = vector.load %arg9[%c0_50, %c0_51] : memref<32x128xf32, #tpu.memory_space<vmem>>, vector<32x128xf32>
    %cst_52 = arith.constant dense<0.000000e+00> : vector<8x128xf32>
    %127 = tpu.matmul %125, %126, %cst_52 {dimension_numbers = #tpu.dot_dimension_numbers<[1], [0], [0], [1], [0, 0, 1, 1], [], []>} : vector<8x32xf32>, vector<32x128xf32>, vector<8x128xf32> -> vector<8x128xf32>
    %c0_53 = arith.constant 0 : index
    %c0_54 = arith.constant 0 : index
    %128 = vector.load %arg10[%c0_53, %c0_54] : memref<1x128xf32, #tpu.memory_space<vmem>>, vector<1x128xf32>
    %129 = vector.broadcast %128 : vector<1x128xf32> to vector<8x128xf32>
    %130 = arith.addf %127, %129 : vector<8x128xf32>
    %cst_55 = arith.constant 5.000000e-01 : f32
    %131 = vector.broadcast %cst_55 : f32 to vector<8x128xf32>
    %132 = arith.mulf %131, %130 : vector<8x128xf32>
    %cst_56 = arith.constant 4.471500e-02 : f32
    %133 = vector.broadcast %cst_56 : f32 to vector<8x128xf32>
    %134 = arith.mulf %133, %130 : vector<8x128xf32>
    %135 = arith.mulf %134, %130 : vector<8x128xf32>
    %136 = arith.mulf %135, %130 : vector<8x128xf32>
    %137 = arith.addf %130, %136 : vector<8x128xf32>
    %cst_57 = arith.constant 0.797884583 : f32
    %138 = vector.broadcast %cst_57 : f32 to vector<8x128xf32>
    %139 = arith.mulf %138, %137 : vector<8x128xf32>
    %140 = math.tanh %139 : vector<8x128xf32>
    %cst_58 = arith.constant 1.000000e+00 : f32
    %141 = vector.broadcast %cst_58 : f32 to vector<8x128xf32>
    %142 = arith.addf %141, %140 : vector<8x128xf32>
    %143 = arith.mulf %132, %142 : vector<8x128xf32>
    %c0_59 = arith.constant 0 : index
    %c0_60 = arith.constant 0 : index
    %144 = vector.load %arg11[%c0_59, %c0_60] : memref<128x32xf32, #tpu.memory_space<vmem>>, vector<128x32xf32>
    %cst_61 = arith.constant dense<0.000000e+00> : vector<8x32xf32>
    %145 = tpu.matmul %143, %144, %cst_61 {dimension_numbers = #tpu.dot_dimension_numbers<[1], [0], [0], [1], [0, 0, 1, 1], [], []>} : vector<8x128xf32>, vector<128x32xf32>, vector<8x32xf32> -> vector<8x32xf32>
    %c0_62 = arith.constant 0 : index
    %c0_63 = arith.constant 0 : index
    %146 = vector.load %arg12[%c0_62, %c0_63] : memref<1x32xf32, #tpu.memory_space<vmem>>, vector<1x32xf32>
    %147 = vector.broadcast %146 : vector<1x32xf32> to vector<8x32xf32>
    %148 = arith.addf %145, %147 : vector<8x32xf32>
    %149 = arith.addf %148, %125 : vector<8x32xf32>
    %cst_64 = arith.constant dense<0.000000e+00> : vector<8xf32>
    %150 = vector.multi_reduction <add>, %149, %cst_64 [1] : vector<8x32xf32> to vector<8xf32>
    %151 = vector.shape_cast %150 : vector<8xf32> to vector<8x1xf32>
    %cst_65 = arith.constant 3.200000e+01 : f32
    %152 = vector.broadcast %cst_65 : f32 to vector<8x1xf32>
    %153 = arith.divf %151, %152 : vector<8x1xf32>
    %154 = vector.broadcast %153 : vector<8x1xf32> to vector<8x32xf32>
    %155 = arith.subf %149, %154 : vector<8x32xf32>
    %156 = arith.mulf %155, %155 : vector<8x32xf32>
    %cst_66 = arith.constant dense<0.000000e+00> : vector<8xf32>
    %157 = vector.multi_reduction <add>, %156, %cst_66 [1] : vector<8x32xf32> to vector<8xf32>
    %158 = vector.shape_cast %157 : vector<8xf32> to vector<8x1xf32>
    %cst_67 = arith.constant 3.200000e+01 : f32
    %159 = vector.broadcast %cst_67 : f32 to vector<8x1xf32>
    %160 = arith.divf %158, %159 : vector<8x1xf32>
    %161 = vector.broadcast %153 : vector<8x1xf32> to vector<8x32xf32>
    %162 = arith.subf %149, %161 : vector<8x32xf32>
    %cst_68 = arith.constant 9.99999996E-13 : f32
    %163 = vector.broadcast %cst_68 : f32 to vector<8x1xf32>
    %164 = arith.addf %160, %163 : vector<8x1xf32>
    %165 = math.rsqrt %164 : vector<8x1xf32>
    %166 = vector.broadcast %165 : vector<8x1xf32> to vector<8x32xf32>
    %167 = arith.mulf %162, %166 : vector<8x32xf32>
    %c0_69 = arith.constant 0 : index
    %c0_70 = arith.constant 0 : index
    %168 = vector.load %arg13[%c0_69, %c0_70] : memref<1x32xf32, #tpu.memory_space<vmem>>, vector<1x32xf32>
    %169 = vector.broadcast %168 : vector<1x32xf32> to vector<8x32xf32>
    %170 = arith.mulf %167, %169 : vector<8x32xf32>
    %c0_71 = arith.constant 0 : index
    %c0_72 = arith.constant 0 : index
    %171 = vector.load %arg14[%c0_71, %c0_72] : memref<1x32xf32, #tpu.memory_space<vmem>>, vector<1x32xf32>
    %172 = vector.broadcast %171 : vector<1x32xf32> to vector<8x32xf32>
    %173 = arith.addf %170, %172 : vector<8x32xf32>
    %c0_73 = arith.constant 0 : index
    %c0_74 = arith.constant 0 : index
    %c0_75 = arith.constant 0 : index
    %174 = vector.load %arg15[%c0_73, %c0_74, %c0_75] : memref<1x8x32xf32, #tpu.memory_space<vmem>>, vector<1x8x32xf32>
    %175 = vector.shape_cast %174 : vector<1x8x32xf32> to vector<8x32xf32>
    %176 = vector.shape_cast %173 : vector<8x32xf32> to vector<1x8x32xf32>
    tpu.vector_store %arg15[%c0_73, %c0_74, %c0_75], %176 {strides = array<i32>} : memref<1x8x32xf32, #tpu.memory_space<vmem>>, vector<1x8x32xf32>,
    return
  }
  func.func @transform_0(%arg0: i32) -> (i32, i32, i32) {
    %c0_i32 = arith.constant 0 : i32
    %c0_i32_0 = arith.constant 0 : i32
    %c0_i32_1 = arith.constant 0 : i32
    return %arg0, %c0_i32, %c0_i32_0 : i32, i32, i32
  }
  func.func @transform_1(%arg0: i32) -> (i32, i32, i32) {
    %c0_i32 = arith.constant 0 : i32
    %c0_i32_0 = arith.constant 0 : i32
    %c0_i32_1 = arith.constant 0 : i32
    return %arg0, %c0_i32, %c0_i32_0 : i32, i32, i32
  }
  func.func @transform_2(%arg0: i32) -> (i32, i32) {
    %c0_i32 = arith.constant 0 : i32
    %c0_i32_0 = arith.constant 0 : i32
    %c0_i32_1 = arith.constant 0 : i32
    return %c0_i32, %c0_i32_0 : i32, i32
  }
  func.func @transform_3(%arg0: i32) -> (i32, i32) {
    %c0_i32 = arith.constant 0 : i32
    %c0_i32_0 = arith.constant 0 : i32
    %c0_i32_1 = arith.constant 0 : i32
    return %c0_i32, %c0_i32_0 : i32, i32
  }
  func.func @transform_4(%arg0: i32) -> (i32, i32) {
    %c0_i32 = arith.constant 0 : i32
    %c0_i32_0 = arith.constant 0 : i32
    %c0_i32_1 = arith.constant 0 : i32
    return %c0_i32, %c0_i32_0 : i32, i32
  }
  func.func @transform_5(%arg0: i32) -> (i32, i32) {
    %c0_i32 = arith.constant 0 : i32
    %c0_i32_0 = arith.constant 0 : i32
    %c0_i32_1 = arith.constant 0 : i32
    return %c0_i32, %c0_i32_0 : i32, i32
  }
  func.func @transform_6(%arg0: i32) -> (i32, i32) {
    %c0_i32 = arith.constant 0 : i32
    %c0_i32_0 = arith.constant 0 : i32
    %c0_i32_1 = arith.constant 0 : i32
    return %c0_i32, %c0_i32_0 : i32, i32
  }
  func.func @transform_7(%arg0: i32) -> (i32, i32) {
    %c0_i32 = arith.constant 0 : i32
    %c0_i32_0 = arith.constant 0 : i32
    %c0_i32_1 = arith.constant 0 : i32
    return %c0_i32, %c0_i32_0 : i32, i32
  }
  func.func @transform_8(%arg0: i32) -> (i32, i32) {
    %c0_i32 = arith.constant 0 : i32
    %c0_i32_0 = arith.constant 0 : i32
    %c0_i32_1 = arith.constant 0 : i32
    return %c0_i32, %c0_i32_0 : i32, i32
  }
  func.func @transform_9(%arg0: i32) -> (i32, i32) {
    %c0_i32 = arith.constant 0 : i32
    %c0_i32_0 = arith.constant 0 : i32
    %c0_i32_1 = arith.constant 0 : i32
    return %c0_i32, %c0_i32_0 : i32, i32
  }
  func.func @transform_10(%arg0: i32) -> (i32, i32) {
    %c0_i32 = arith.constant 0 : i32
    %c0_i32_0 = arith.constant 0 : i32
    %c0_i32_1 = arith.constant 0 : i32
    return %c0_i32, %c0_i32_0 : i32, i32
  }
  func.func @transform_11(%arg0: i32) -> (i32, i32) {
    %c0_i32 = arith.constant 0 : i32
    %c0_i32_0 = arith.constant 0 : i32
    %c0_i32_1 = arith.constant 0 : i32
    return %c0_i32, %c0_i32_0 : i32, i32
  }
  func.func @transform_12(%arg0: i32) -> (i32, i32) {
    %c0_i32 = arith.constant 0 : i32
    %c0_i32_0 = arith.constant 0 : i32
    %c0_i32_1 = arith.constant 0 : i32
    return %c0_i32, %c0_i32_0 : i32, i32
  }
  func.func @transform_13(%arg0: i32) -> (i32, i32) {
    %c0_i32 = arith.constant 0 : i32
    %c0_i32_0 = arith.constant 0 : i32
    %c0_i32_1 = arith.constant 0 : i32
    return %c0_i32, %c0_i32_0 : i32, i32
  }
  func.func @transform_14(%arg0: i32) -> (i32, i32, i32) {
    %c0_i32 = arith.constant 0 : i32
    %c0_i32_0 = arith.constant 0 : i32
    %c0_i32_1 = arith.constant 0 : i32
    return %arg0, %c0_i32, %c0_i32_0 : i32, i32, i32
  }
}

module attributes {stable_mosaic.version = 11 : i64} {
  func.func @_graph_attn_kernel(%arg0: i32, %arg1: memref<1x2x32xf32, #tpu.memory_space<vmem>>, %arg2: memref<32x96xf32, #tpu.memory_space<vmem>>, %arg3: memref<1x96xf32, #tpu.memory_space<vmem>>, %arg4: memref<1x2x32xf32, #tpu.memory_space<vmem>>) attributes {dimension_semantics = [#tpu.dimension_semantics<parallel>], iteration_bounds = array<i64: 4>, scalar_prefetch = 0 : i64, scratch_operands = 0 : i64, tpu.core_type = #tpu.core_type<tc>, window_params = [{transform_indices = @transform_0, window_bounds = array<i64: 1, 2, 32>}, {pipeline_mode = #tpu.pipeline_mode<synchronous>, transform_indices = @transform_1, window_bounds = array<i64: 32, 96>}, {pipeline_mode = #tpu.pipeline_mode<synchronous>, transform_indices = @transform_2, window_bounds = array<i64: 1, 96>}, {transform_indices = @transform_3, window_bounds = array<i64: 1, 2, 32>}]} {
    %c0 = arith.constant 0 : index
    %c0_0 = arith.constant 0 : index
    %c0_1 = arith.constant 0 : index
    %0 = vector.load %arg1[%c0, %c0_0, %c0_1] : memref<1x2x32xf32, #tpu.memory_space<vmem>>, vector<1x2x32xf32>
    %1 = vector.shape_cast %0 : vector<1x2x32xf32> to vector<2x32xf32>
    %c0_2 = arith.constant 0 : index
    %c0_3 = arith.constant 0 : index
    %2 = vector.load %arg2[%c0_2, %c0_3] : memref<32x96xf32, #tpu.memory_space<vmem>>, vector<32x96xf32>
    %cst = arith.constant dense<0.000000e+00> : vector<2x96xf32>
    %3 = tpu.matmul %1, %2, %cst {dimension_numbers = #tpu.dot_dimension_numbers<[1], [0], [0], [1], [0, 0, 1, 1], [], []>} : vector<2x32xf32>, vector<32x96xf32>, vector<2x96xf32> -> vector<2x96xf32>
    %c0_4 = arith.constant 0 : index
    %c0_5 = arith.constant 0 : index
    %4 = vector.load %arg3[%c0_4, %c0_5] : memref<1x96xf32, #tpu.memory_space<vmem>>, vector<1x96xf32>
    %5 = vector.broadcast %4 : vector<1x96xf32> to vector<2x96xf32>
    %6 = arith.addf %3, %5 : vector<2x96xf32>
    %7 = vector.extract_strided_slice %6 {offsets = [0, 0], sizes = [2, 32], strides = [1, 1]} : vector<2x96xf32> to vector<2x32xf32>
    %8 = vector.extract_strided_slice %6 {offsets = [0, 32], sizes = [2, 32], strides = [1, 1]} : vector<2x96xf32> to vector<2x32xf32>
    %9 = vector.extract_strided_slice %6 {offsets = [0, 64], sizes = [2, 32], strides = [1, 1]} : vector<2x96xf32> to vector<2x32xf32>
    %cst_6 = arith.constant dense<0.000000e+00> : vector<2x2xf32>
    %10 = tpu.matmul %7, %8, %cst_6 {dimension_numbers = #tpu.dot_dimension_numbers<[1], [1], [0], [0], [0, 0, 1, 0], [], []>} : vector<2x32xf32>, vector<2x32xf32>, vector<2x2xf32> -> vector<2x2xf32>
    %cst_7 = arith.constant 0.176776692 : f32
    %11 = vector.broadcast %cst_7 : f32 to vector<2x2xf32>
    %12 = arith.mulf %10, %11 : vector<2x2xf32>
    %cst_8 = arith.constant dense<0xFF800000> : vector<2xf32>
    %13 = vector.multi_reduction <maximumf>, %12, %cst_8 [1] : vector<2x2xf32> to vector<2xf32>
    %14 = vector.shape_cast %13 : vector<2xf32> to vector<2x1xf32>
    %15 = vector.broadcast %14 : vector<2x1xf32> to vector<2x2xf32>
    %16 = arith.subf %12, %15 : vector<2x2xf32>
    %17 = math.exp %16 : vector<2x2xf32>
    %cst_9 = arith.constant dense<0.000000e+00> : vector<2xf32>
    %18 = vector.multi_reduction <add>, %17, %cst_9 [1] : vector<2x2xf32> to vector<2xf32>
    %19 = vector.shape_cast %18 : vector<2xf32> to vector<2x1xf32>
    %20 = tpu.reciprocal %19 {approx = true} : vector<2x1xf32> -> vector<2x1xf32>
    %21 = vector.broadcast %20 : vector<2x1xf32> to vector<2x2xf32>
    %22 = arith.mulf %17, %21 : vector<2x2xf32>
    %cst_10 = arith.constant dense<0.000000e+00> : vector<2x32xf32>
    %23 = tpu.matmul %22, %9, %cst_10 {dimension_numbers = #tpu.dot_dimension_numbers<[1], [0], [0], [1], [0, 0, 1, 1], [], []>} : vector<2x2xf32>, vector<2x32xf32>, vector<2x32xf32> -> vector<2x32xf32>
    %c0_11 = arith.constant 0 : index
    %c0_12 = arith.constant 0 : index
    %c0_13 = arith.constant 0 : index
    %24 = vector.load %arg4[%c0_11, %c0_12, %c0_13] : memref<1x2x32xf32, #tpu.memory_space<vmem>>, vector<1x2x32xf32>
    %25 = vector.shape_cast %24 : vector<1x2x32xf32> to vector<2x32xf32>
    %26 = vector.shape_cast %23 : vector<2x32xf32> to vector<1x2x32xf32>
    tpu.vector_store %arg4[%c0_11, %c0_12, %c0_13], %26 {strides = array<i32>} : memref<1x2x32xf32, #tpu.memory_space<vmem>>, vector<1x2x32xf32>,
    return
  }
  func.func @transform_0(%arg0: i32) -> (i32, i32, i32) {
    %c0_i32 = arith.constant 0 : i32
    %c0_i32_0 = arith.constant 0 : i32
    %c0_i32_1 = arith.constant 0 : i32
    return %arg0, %c0_i32, %c0_i32_0 : i32, i32, i32
  }
  func.func @transform_1(%arg0: i32) -> (i32, i32) {
    %c0_i32 = arith.constant 0 : i32
    %c0_i32_0 = arith.constant 0 : i32
    %c0_i32_1 = arith.constant 0 : i32
    return %c0_i32, %c0_i32_0 : i32, i32
  }
  func.func @transform_2(%arg0: i32) -> (i32, i32) {
    %c0_i32 = arith.constant 0 : i32
    %c0_i32_0 = arith.constant 0 : i32
    %c0_i32_1 = arith.constant 0 : i32
    return %c0_i32, %c0_i32_0 : i32, i32
  }
  func.func @transform_3(%arg0: i32) -> (i32, i32, i32) {
    %c0_i32 = arith.constant 0 : i32
    %c0_i32_0 = arith.constant 0 : i32
    %c0_i32_1 = arith.constant 0 : i32
    return %arg0, %c0_i32, %c0_i32_0 : i32, i32, i32
  }
}

module attributes {stable_mosaic.version = 11 : i64} {
  func.func @_graph_attn_kernel(%arg0: i32, %arg1: memref<1x2x32xf32, #tpu.memory_space<vmem>>, %arg2: memref<32x96xf32, #tpu.memory_space<vmem>>, %arg3: memref<1x96xf32, #tpu.memory_space<vmem>>, %arg4: memref<1x2x32xf32, #tpu.memory_space<vmem>>) attributes {dimension_semantics = [#tpu.dimension_semantics<parallel>], iteration_bounds = array<i64: 2>, scalar_prefetch = 0 : i64, scratch_operands = 0 : i64, tpu.core_type = #tpu.core_type<tc>, window_params = [{transform_indices = @transform_0, window_bounds = array<i64: 1, 2, 32>}, {pipeline_mode = #tpu.pipeline_mode<synchronous>, transform_indices = @transform_1, window_bounds = array<i64: 32, 96>}, {pipeline_mode = #tpu.pipeline_mode<synchronous>, transform_indices = @transform_2, window_bounds = array<i64: 1, 96>}, {transform_indices = @transform_3, window_bounds = array<i64: 1, 2, 32>}]} {
    %c0 = arith.constant 0 : index
    %c0_0 = arith.constant 0 : index
    %c0_1 = arith.constant 0 : index
    %0 = vector.load %arg1[%c0, %c0_0, %c0_1] : memref<1x2x32xf32, #tpu.memory_space<vmem>>, vector<1x2x32xf32>
    %1 = vector.shape_cast %0 : vector<1x2x32xf32> to vector<2x32xf32>
    %c0_2 = arith.constant 0 : index
    %c0_3 = arith.constant 0 : index
    %2 = vector.load %arg2[%c0_2, %c0_3] : memref<32x96xf32, #tpu.memory_space<vmem>>, vector<32x96xf32>
    %cst = arith.constant dense<0.000000e+00> : vector<2x96xf32>
    %3 = tpu.matmul %1, %2, %cst {dimension_numbers = #tpu.dot_dimension_numbers<[1], [0], [0], [1], [0, 0, 1, 1], [], []>} : vector<2x32xf32>, vector<32x96xf32>, vector<2x96xf32> -> vector<2x96xf32>
    %c0_4 = arith.constant 0 : index
    %c0_5 = arith.constant 0 : index
    %4 = vector.load %arg3[%c0_4, %c0_5] : memref<1x96xf32, #tpu.memory_space<vmem>>, vector<1x96xf32>
    %5 = vector.broadcast %4 : vector<1x96xf32> to vector<2x96xf32>
    %6 = arith.addf %3, %5 : vector<2x96xf32>
    %7 = vector.extract_strided_slice %6 {offsets = [0, 0], sizes = [2, 32], strides = [1, 1]} : vector<2x96xf32> to vector<2x32xf32>
    %8 = vector.extract_strided_slice %6 {offsets = [0, 32], sizes = [2, 32], strides = [1, 1]} : vector<2x96xf32> to vector<2x32xf32>
    %9 = vector.extract_strided_slice %6 {offsets = [0, 64], sizes = [2, 32], strides = [1, 1]} : vector<2x96xf32> to vector<2x32xf32>
    %cst_6 = arith.constant dense<0.000000e+00> : vector<2x2xf32>
    %10 = tpu.matmul %7, %8, %cst_6 {dimension_numbers = #tpu.dot_dimension_numbers<[1], [1], [0], [0], [0, 0, 1, 0], [], []>} : vector<2x32xf32>, vector<2x32xf32>, vector<2x2xf32> -> vector<2x2xf32>
    %cst_7 = arith.constant 0.176776692 : f32
    %11 = vector.broadcast %cst_7 : f32 to vector<2x2xf32>
    %12 = arith.mulf %10, %11 : vector<2x2xf32>
    %cst_8 = arith.constant dense<0xFF800000> : vector<2xf32>
    %13 = vector.multi_reduction <maximumf>, %12, %cst_8 [1] : vector<2x2xf32> to vector<2xf32>
    %14 = vector.shape_cast %13 : vector<2xf32> to vector<2x1xf32>
    %15 = vector.broadcast %14 : vector<2x1xf32> to vector<2x2xf32>
    %16 = arith.subf %12, %15 : vector<2x2xf32>
    %17 = math.exp %16 : vector<2x2xf32>
    %cst_9 = arith.constant dense<0.000000e+00> : vector<2xf32>
    %18 = vector.multi_reduction <add>, %17, %cst_9 [1] : vector<2x2xf32> to vector<2xf32>
    %19 = vector.shape_cast %18 : vector<2xf32> to vector<2x1xf32>
    %20 = tpu.reciprocal %19 {approx = true} : vector<2x1xf32> -> vector<2x1xf32>
    %21 = vector.broadcast %20 : vector<2x1xf32> to vector<2x2xf32>
    %22 = arith.mulf %17, %21 : vector<2x2xf32>
    %cst_10 = arith.constant dense<0.000000e+00> : vector<2x32xf32>
    %23 = tpu.matmul %22, %9, %cst_10 {dimension_numbers = #tpu.dot_dimension_numbers<[1], [0], [0], [1], [0, 0, 1, 1], [], []>} : vector<2x2xf32>, vector<2x32xf32>, vector<2x32xf32> -> vector<2x32xf32>
    %c0_11 = arith.constant 0 : index
    %c0_12 = arith.constant 0 : index
    %c0_13 = arith.constant 0 : index
    %24 = vector.load %arg4[%c0_11, %c0_12, %c0_13] : memref<1x2x32xf32, #tpu.memory_space<vmem>>, vector<1x2x32xf32>
    %25 = vector.shape_cast %24 : vector<1x2x32xf32> to vector<2x32xf32>
    %26 = vector.shape_cast %23 : vector<2x32xf32> to vector<1x2x32xf32>
    tpu.vector_store %arg4[%c0_11, %c0_12, %c0_13], %26 {strides = array<i32>} : memref<1x2x32xf32, #tpu.memory_space<vmem>>, vector<1x2x32xf32>,
    return
  }
  func.func @transform_0(%arg0: i32) -> (i32, i32, i32) {
    %c0_i32 = arith.constant 0 : i32
    %c0_i32_0 = arith.constant 0 : i32
    %c0_i32_1 = arith.constant 0 : i32
    return %arg0, %c0_i32, %c0_i32_0 : i32, i32, i32
  }
  func.func @transform_1(%arg0: i32) -> (i32, i32) {
    %c0_i32 = arith.constant 0 : i32
    %c0_i32_0 = arith.constant 0 : i32
    %c0_i32_1 = arith.constant 0 : i32
    return %c0_i32, %c0_i32_0 : i32, i32
  }
  func.func @transform_2(%arg0: i32) -> (i32, i32) {
    %c0_i32 = arith.constant 0 : i32
    %c0_i32_0 = arith.constant 0 : i32
    %c0_i32_1 = arith.constant 0 : i32
    return %c0_i32, %c0_i32_0 : i32, i32
  }
  func.func @transform_3(%arg0: i32) -> (i32, i32, i32) {
    %c0_i32 = arith.constant 0 : i32
    %c0_i32_0 = arith.constant 0 : i32
    %c0_i32_1 = arith.constant 0 : i32
    return %arg0, %c0_i32, %c0_i32_0 : i32, i32, i32
  }
}

module attributes {stable_mosaic.version = 11 : i64} {
  func.func @_graph_attn_kernel(%arg0: i32, %arg1: memref<1x3x32xf32, #tpu.memory_space<vmem>>, %arg2: memref<32x96xf32, #tpu.memory_space<vmem>>, %arg3: memref<1x96xf32, #tpu.memory_space<vmem>>, %arg4: memref<1x3x32xf32, #tpu.memory_space<vmem>>) attributes {dimension_semantics = [#tpu.dimension_semantics<parallel>], iteration_bounds = array<i64: 4>, scalar_prefetch = 0 : i64, scratch_operands = 0 : i64, tpu.core_type = #tpu.core_type<tc>, window_params = [{transform_indices = @transform_0, window_bounds = array<i64: 1, 3, 32>}, {pipeline_mode = #tpu.pipeline_mode<synchronous>, transform_indices = @transform_1, window_bounds = array<i64: 32, 96>}, {pipeline_mode = #tpu.pipeline_mode<synchronous>, transform_indices = @transform_2, window_bounds = array<i64: 1, 96>}, {transform_indices = @transform_3, window_bounds = array<i64: 1, 3, 32>}]} {
    %c0 = arith.constant 0 : index
    %c0_0 = arith.constant 0 : index
    %c0_1 = arith.constant 0 : index
    %0 = vector.load %arg1[%c0, %c0_0, %c0_1] : memref<1x3x32xf32, #tpu.memory_space<vmem>>, vector<1x3x32xf32>
    %1 = vector.shape_cast %0 : vector<1x3x32xf32> to vector<3x32xf32>
    %c0_2 = arith.constant 0 : index
    %c0_3 = arith.constant 0 : index
    %2 = vector.load %arg2[%c0_2, %c0_3] : memref<32x96xf32, #tpu.memory_space<vmem>>, vector<32x96xf32>
    %cst = arith.constant dense<0.000000e+00> : vector<3x96xf32>
    %3 = tpu.matmul %1, %2, %cst {dimension_numbers = #tpu.dot_dimension_numbers<[1], [0], [0], [1], [0, 0, 1, 1], [], []>} : vector<3x32xf32>, vector<32x96xf32>, vector<3x96xf32> -> vector<3x96xf32>
    %c0_4 = arith.constant 0 : index
    %c0_5 = arith.constant 0 : index
    %4 = vector.load %arg3[%c0_4, %c0_5] : memref<1x96xf32, #tpu.memory_space<vmem>>, vector<1x96xf32>
    %5 = vector.broadcast %4 : vector<1x96xf32> to vector<3x96xf32>
    %6 = arith.addf %3, %5 : vector<3x96xf32>
    %7 = vector.extract_strided_slice %6 {offsets = [0, 0], sizes = [3, 32], strides = [1, 1]} : vector<3x96xf32> to vector<3x32xf32>
    %8 = vector.extract_strided_slice %6 {offsets = [0, 32], sizes = [3, 32], strides = [1, 1]} : vector<3x96xf32> to vector<3x32xf32>
    %9 = vector.extract_strided_slice %6 {offsets = [0, 64], sizes = [3, 32], strides = [1, 1]} : vector<3x96xf32> to vector<3x32xf32>
    %cst_6 = arith.constant dense<0.000000e+00> : vector<3x3xf32>
    %10 = tpu.matmul %7, %8, %cst_6 {dimension_numbers = #tpu.dot_dimension_numbers<[1], [1], [0], [0], [0, 0, 1, 0], [], []>} : vector<3x32xf32>, vector<3x32xf32>, vector<3x3xf32> -> vector<3x3xf32>
    %cst_7 = arith.constant 0.176776692 : f32
    %11 = vector.broadcast %cst_7 : f32 to vector<3x3xf32>
    %12 = arith.mulf %10, %11 : vector<3x3xf32>
    %cst_8 = arith.constant dense<0xFF800000> : vector<3xf32>
    %13 = vector.multi_reduction <maximumf>, %12, %cst_8 [1] : vector<3x3xf32> to vector<3xf32>
    %14 = vector.shape_cast %13 : vector<3xf32> to vector<3x1xf32>
    %15 = vector.broadcast %14 : vector<3x1xf32> to vector<3x3xf32>
    %16 = arith.subf %12, %15 : vector<3x3xf32>
    %17 = math.exp %16 : vector<3x3xf32>
    %cst_9 = arith.constant dense<0.000000e+00> : vector<3xf32>
    %18 = vector.multi_reduction <add>, %17, %cst_9 [1] : vector<3x3xf32> to vector<3xf32>
    %19 = vector.shape_cast %18 : vector<3xf32> to vector<3x1xf32>
    %20 = tpu.reciprocal %19 {approx = true} : vector<3x1xf32> -> vector<3x1xf32>
    %21 = vector.broadcast %20 : vector<3x1xf32> to vector<3x3xf32>
    %22 = arith.mulf %17, %21 : vector<3x3xf32>
    %cst_10 = arith.constant dense<0.000000e+00> : vector<3x32xf32>
    %23 = tpu.matmul %22, %9, %cst_10 {dimension_numbers = #tpu.dot_dimension_numbers<[1], [0], [0], [1], [0, 0, 1, 1], [], []>} : vector<3x3xf32>, vector<3x32xf32>, vector<3x32xf32> -> vector<3x32xf32>
    %c0_11 = arith.constant 0 : index
    %c0_12 = arith.constant 0 : index
    %c0_13 = arith.constant 0 : index
    %24 = vector.load %arg4[%c0_11, %c0_12, %c0_13] : memref<1x3x32xf32, #tpu.memory_space<vmem>>, vector<1x3x32xf32>
    %25 = vector.shape_cast %24 : vector<1x3x32xf32> to vector<3x32xf32>
    %26 = vector.shape_cast %23 : vector<3x32xf32> to vector<1x3x32xf32>
    tpu.vector_store %arg4[%c0_11, %c0_12, %c0_13], %26 {strides = array<i32>} : memref<1x3x32xf32, #tpu.memory_space<vmem>>, vector<1x3x32xf32>,
    return
  }
  func.func @transform_0(%arg0: i32) -> (i32, i32, i32) {
    %c0_i32 = arith.constant 0 : i32
    %c0_i32_0 = arith.constant 0 : i32
    %c0_i32_1 = arith.constant 0 : i32
    return %arg0, %c0_i32, %c0_i32_0 : i32, i32, i32
  }
  func.func @transform_1(%arg0: i32) -> (i32, i32) {
    %c0_i32 = arith.constant 0 : i32
    %c0_i32_0 = arith.constant 0 : i32
    %c0_i32_1 = arith.constant 0 : i32
    return %c0_i32, %c0_i32_0 : i32, i32
  }
  func.func @transform_2(%arg0: i32) -> (i32, i32) {
    %c0_i32 = arith.constant 0 : i32
    %c0_i32_0 = arith.constant 0 : i32
    %c0_i32_1 = arith.constant 0 : i32
    return %c0_i32, %c0_i32_0 : i32, i32
  }
  func.func @transform_3(%arg0: i32) -> (i32, i32, i32) {
    %c0_i32 = arith.constant 0 : i32
    %c0_i32_0 = arith.constant 0 : i32
    %c0_i32_1 = arith.constant 0 : i32
    return %arg0, %c0_i32, %c0_i32_0 : i32, i32, i32
  }
}

</mosaic_0001>

<bundles_post_ra>
// kernel: encoder_forward.6
= control target key start
LH: loop header
LB: loop body
LE: loop exit
PB: predicated region body
PF: predicated region fallthrough
CT: control target
= control target key end

     0   :  { %s569_s12 = smov 0   ;;  %s611_s0 = inlined_call_operand.vmem [shape: f32[2,2,32], index: 0, kind: input, shape index: {}]   ;;  %s612_s1 = inlined_call_operand.vmem [shape: f32[32,96], index: 1, kind: input, shape index: {}]   ;;  %s613_s2 = inlined_call_operand.vmem [shape: f32[1,96], index: 2, kind: input, shape index: {}]   ;;  %s614_s3 = inlined_call_operand.vmem [shape: f32[2,2,32], index: 3, kind: output, shape index: {}]  }
   0x1 LB: > { %s476_s13 = sadd.s32 4294967295, %s543_s12   ;;  %p480_p0 = scmp.ge.s32.totalorder %s543_s12, 1  ;;  %s543_s12 = sphi %s569_s12, %s13_s12  }
   0x2   : > { %p136_p1 = scmp.lt.s32.totalorder %s543_s12, 3 }
   0x4   : > { %p137_p2 = pnand %p480_p0, %p136_p1 }
   0x5   : > { %p158_p3 = scmp.lt.s32.totalorder (!%p137_p2), %s476_s13, 1  ;;  %s547_s28 = smov (!%p137_p2), 96  }
   0x6   : > { %140 = sbr.rel (%p137_p2) target bundleno = 1035 (0x40b), region = 32  ;;  %s548_s29 = smov (!%p137_p2), 64  }
   0xb   : > { %v170_v0 = vld [vmem:[%s612_s1 + $0x18] sm:$0xff]  ;;  %v545_v1 = vmov 0.0   ;;  %v169_v2 = vld [vmem:[%s612_s1 + $0x10] sm:$0xff]  ;;  %vm546_vm0 = vmmov 0   ;;  %s616_s13 = smov (!%p158_p3, %s476_s13), 1  ;;  %v168_v3 = vld [vmem:[%s612_s1 + $0x8] sm:$0xff] }
   0xc   : > { %500 = vmatprep.subr.mxu0 %v545_v1  ;;  %508 = vmatprep.mubr.msk.f32.mxu0 %vm546_vm0, %v545_v1  ;;  %s481_s20 = sshll.u32 %s616_s13, 1  ;;  %v167_v4 = vld [vmem:[%s612_s1] sm:$0xff]  ;;  %vm178_vm1 = vcmask 261120   ;;  %vm330_vm2 = vcmask 9216   ;;  %vm348_vm3 = vcmask 1041408   ;;  %vm344_vm4 = vcmask 15360  }
   0xd   : > { %501 = vmatpush3.msra.mxu0 %v170_v0  ;;  %511 = vmatprep.subr.mxu1 %v545_v1  ;;  %s161_s25 = scalar_lea.vmem %s611_s0, %s481_s20  ;;  %v483_v6 = vld [vmem:[%s613_s2] ss:$0 sm:$0xff]  ;;  %s165_s5 = scalar_lea.vmem %s614_s3, %s481_s20  ;;  %vm421_vm5 = vcmask 254976  }
   0xe   : > { %502 = vmatprep.subr.mxu0 %v545_v1  ;;  %513 = vmatprep.mubr.msk.f32.mxu1 %vm546_vm0, %v545_v1  ;;  %v166_v5 = vld [vmem:[%s161_s25] sm:$0x3] }
   0xf   : > { %503 = vmatpush3.msra.mxu0 %v169_v2 }
  0x10   : > { %504 = vmatprep.subr.mxu0 %v545_v1 }
  0x11   : > { %505 = vmatpush3.msra.mxu0 %v168_v3 }
  0x12   : > { %506 = vmatprep.subr.mxu0 %v545_v1 }
  0x13   : > { %507 = vmatpush3.msra.mxu0 %v167_v4 }
  0x14   : > { %509 = vmatmul.mubr.msk.f32.vlgmr.msra.gmra.mxu0 %vm178_vm1, %v166_v5 }
  0xd4   : > { %v248_v7 = vpop.f32.mrf.mxu0 }
  0xd5   : > { %v249_v8 = vadd.f32 %v483_v6, %v248_v7 }
  0xd6   : > { %v510_v9 = vpop.f32.mrf.mxu0 }
  0xd7   : > { %253 = vrot.lane.b32.xlu0 %v249_v8, %s547_s28 }
 0x149   : > { %v254_v10 = vpop.permute.xlu0 %253 }
 0x14a   : > { %512 = vmatpush3.xpose.msk.msra.mxu1 %vm178_vm1, %v254_v10 }
 0x14b   : > { %516 = vmatprep.subr.mxu1 %v545_v1 }
 0x14d   : > { %514 = vmatmul.mubr.msk.f32.vlgmr.msra.gmra.mxu1 %vm178_vm1, %v249_v8 }
 0x14e   : > { %518 = vmatprep.mubr.msk.f32.mxu1 %vm546_vm0, %v545_v1 }
 0x20d   : > { %v325_v11 = vpop.f32.mrf.mxu1 }
 0x20e   : > { %v329_v12 = vmul.f32 0.17677669, %v325_v11 }
 0x20f   : > { %v515_v13 = vpop.f32.mrf.mxu1 }
 0x210   : > { %v331_v14 = vsel %vm330_vm2, %v329_v12, -inf }
 0x211   : > { %332 = vmax.xlane.f32.xlu0 %v331_v14 }
 0x29a   : > { %v333_v15 = vpop.xlane.xlu0 %332 }
 0x29b   : > { %v334_v16 = vsub.f32 %v329_v12, %v333_v15 }
 0x29d   : > { %v335_v17 = vmul.f32 1.442695, %v334_v16 }
 0x29f   : > { %533 = vpow2.f32 %v335_v17 }
 0x2ac   : > { %v534_v18 = vpop.eup %533 }
 0x2ad   : > { %v337_v19 = vsel %vm330_vm2, %v534_v18, 0.0 }
 0x2ae   : > { %338 = vadd.xlane.f32.xlu1 %v337_v19 }
 0x2bf   : > { %342 = vrot.lane.b32.xlu1 %v249_v8, %s548_s29 }
 0x337   : > { %v339_v20 = vpop.xlane.xlu1 %338 }
 0x338   : > { %535 = vrcp.f32 %v339_v20 }
 0x33b   : > { %v343_v21 = vpop.permute.xlu1 %342 }
 0x33c   : > { %517 = vmatpush3.msk.msra.mxu1 %vm348_vm3, %v343_v21 }
 0x345   : > { %v536_v22 = vpop.eup %535 }
 0x346   : > { %v341_v23 = vmul.f32 %v536_v22, %v534_v18 }
 0x348   : > { %519 = vmatmul.mubr.msk.f32.vlgmr.msra.gmra.mxu1 %vm344_vm4, %v341_v23 }
 0x408   : > { %v417_v24 = vpop.f32.mrf.mxu1 }
 0x409   : > { %422 = vst.msk [vmem:[%s165_s5] sm:$0x3] %vm421_vm5, %v417_v24 }
 0x40a   : > { %v520_v25 = vpop.f32.mrf.mxu1 }
 0x40b PF: > { %s13_s12 = sadd.s32 1, %s543_s12  }
 0x40c   : > { %p10_p4 = scmp.ge.s32.totalorder %s13_s12, 4  }
 0x40e   :  { %12 = sbr.rel (!%p10_p4) target bundleno = 1 (0x1), region = 62 }

// kernel: encoder_forward.7
= control target key start
LH: loop header
LB: loop body
LE: loop exit
PB: predicated region body
PF: predicated region fallthrough
CT: control target
= control target key end

     0   :  { %s569_s12 = smov 0   ;;  %s611_s0 = inlined_call_operand.vmem [shape: f32[4,2,32], index: 0, kind: input, shape index: {}]   ;;  %s612_s1 = inlined_call_operand.vmem [shape: f32[32,96], index: 1, kind: input, shape index: {}]   ;;  %s613_s2 = inlined_call_operand.vmem [shape: f32[1,96], index: 2, kind: input, shape index: {}]   ;;  %s614_s3 = inlined_call_operand.vmem [shape: f32[4,2,32], index: 3, kind: output, shape index: {}]  }
   0x1 LB: > { %s476_s13 = sadd.s32 4294967295, %s543_s12   ;;  %p480_p0 = scmp.ge.s32.totalorder %s543_s12, 1  ;;  %s543_s12 = sphi %s569_s12, %s13_s12  }
   0x2   : > { %p136_p1 = scmp.lt.s32.totalorder %s543_s12, 5 }
   0x4   : > { %p137_p2 = pnand %p480_p0, %p136_p1 }
   0x5   : > { %p158_p3 = scmp.lt.s32.totalorder (!%p137_p2), %s476_s13, 3  ;;  %s547_s28 = smov (!%p137_p2), 96  }
   0x6   : > { %140 = sbr.rel (%p137_p2) target bundleno = 1035 (0x40b), region = 32  ;;  %s548_s29 = smov (!%p137_p2), 64  }
   0xb   : > { %v170_v0 = vld [vmem:[%s612_s1 + $0x18] sm:$0xff]  ;;  %v545_v1 = vmov 0.0   ;;  %v169_v2 = vld [vmem:[%s612_s1 + $0x10] sm:$0xff]  ;;  %vm546_vm0 = vmmov 0   ;;  %s616_s13 = smov (!%p158_p3, %s476_s13), 3  ;;  %v168_v3 = vld [vmem:[%s612_s1 + $0x8] sm:$0xff] }
   0xc   : > { %500 = vmatprep.subr.mxu0 %v545_v1  ;;  %508 = vmatprep.mubr.msk.f32.mxu0 %vm546_vm0, %v545_v1  ;;  %s481_s20 = sshll.u32 %s616_s13, 1  ;;  %v167_v4 = vld [vmem:[%s612_s1] sm:$0xff]  ;;  %vm178_vm1 = vcmask 261120   ;;  %vm330_vm2 = vcmask 9216   ;;  %vm348_vm3 = vcmask 1041408   ;;  %vm344_vm4 = vcmask 15360  }
   0xd   : > { %501 = vmatpush3.msra.mxu0 %v170_v0  ;;  %511 = vmatprep.subr.mxu1 %v545_v1  ;;  %s161_s25 = scalar_lea.vmem %s611_s0, %s481_s20  ;;  %v483_v6 = vld [vmem:[%s613_s2] ss:$0 sm:$0xff]  ;;  %s165_s5 = scalar_lea.vmem %s614_s3, %s481_s20  ;;  %vm421_vm5 = vcmask 254976  }
   0xe   : > { %502 = vmatprep.subr.mxu0 %v545_v1  ;;  %513 = vmatprep.mubr.msk.f32.mxu1 %vm546_vm0, %v545_v1  ;;  %v166_v5 = vld [vmem:[%s161_s25] sm:$0x3] }
   0xf   : > { %503 = vmatpush3.msra.mxu0 %v169_v2 }
  0x10   : > { %504 = vmatprep.subr.mxu0 %v545_v1 }
  0x11   : > { %505 = vmatpush3.msra.mxu0 %v168_v3 }
  0x12   : > { %506 = vmatprep.subr.mxu0 %v545_v1 }
  0x13   : > { %507 = vmatpush3.msra.mxu0 %v167_v4 }
  0x14   : > { %509 = vmatmul.mubr.msk.f32.vlgmr.msra.gmra.mxu0 %vm178_vm1, %v166_v5 }
  0xd4   : > { %v248_v7 = vpop.f32.mrf.mxu0 }
  0xd5   : > { %v249_v8 = vadd.f32 %v483_v6, %v248_v7 }
  0xd6   : > { %v510_v9 = vpop.f32.mrf.mxu0 }
  0xd7   : > { %253 = vrot.lane.b32.xlu0 %v249_v8, %s547_s28 }
 0x149   : > { %v254_v10 = vpop.permute.xlu0 %253 }
 0x14a   : > { %512 = vmatpush3.xpose.msk.msra.mxu1 %vm178_vm1, %v254_v10 }
 0x14b   : > { %516 = vmatprep.subr.mxu1 %v545_v1 }
 0x14d   : > { %514 = vmatmul.mubr.msk.f32.vlgmr.msra.gmra.mxu1 %vm178_vm1, %v249_v8 }
 0x14e   : > { %518 = vmatprep.mubr.msk.f32.mxu1 %vm546_vm0, %v545_v1 }
 0x20d   : > { %v325_v11 = vpop.f32.mrf.mxu1 }
 0x20e   : > { %v329_v12 = vmul.f32 0.17677669, %v325_v11 }
 0x20f   : > { %v515_v13 = vpop.f32.mrf.mxu1 }
 0x210   : > { %v331_v14 = vsel %vm330_vm2, %v329_v12, -inf }
 0x211   : > { %332 = vmax.xlane.f32.xlu0 %v331_v14 }
 0x29a   : > { %v333_v15 = vpop.xlane.xlu0 %332 }
 0x29b   : > { %v334_v16 = vsub.f32 %v329_v12, %v333_v15 }
 0x29d   : > { %v335_v17 = vmul.f32 1.442695, %v334_v16 }
 0x29f   : > { %533 = vpow2.f32 %v335_v17 }
 0x2ac   : > { %v534_v18 = vpop.eup %533 }
 0x2ad   : > { %v337_v19 = vsel %vm330_vm2, %v534_v18, 0.0 }
 0x2ae   : > { %338 = vadd.xlane.f32.xlu1 %v337_v19 }
 0x2bf   : > { %342 = vrot.lane.b32.xlu1 %v249_v8, %s548_s29 }
 0x337   : > { %v339_v20 = vpop.xlane.xlu1 %338 }
 0x338   : > { %535 = vrcp.f32 %v339_v20 }
 0x33b   : > { %v343_v21 = vpop.permute.xlu1 %342 }
 0x33c   : > { %517 = vmatpush3.msk.msra.mxu1 %vm348_vm3, %v343_v21 }
 0x345   : > { %v536_v22 = vpop.eup %535 }
 0x346   : > { %v341_v23 = vmul.f32 %v536_v22, %v534_v18 }
 0x348   : > { %519 = vmatmul.mubr.msk.f32.vlgmr.msra.gmra.mxu1 %vm344_vm4, %v341_v23 }
 0x408   : > { %v417_v24 = vpop.f32.mrf.mxu1 }
 0x409   : > { %422 = vst.msk [vmem:[%s165_s5] sm:$0x3] %vm421_vm5, %v417_v24 }
 0x40a   : > { %v520_v25 = vpop.f32.mrf.mxu1 }
 0x40b PF: > { %s13_s12 = sadd.s32 1, %s543_s12  }
 0x40c   : > { %p10_p4 = scmp.ge.s32.totalorder %s13_s12, 6  }
 0x40e   :  { %12 = sbr.rel (!%p10_p4) target bundleno = 1 (0x1), region = 62 }

// kernel: encoder_forward.5
= control target key start
LH: loop header
LB: loop body
LE: loop exit
PB: predicated region body
PF: predicated region fallthrough
CT: control target
= control target key end

     0   :  { %s2197_s29 = smov 0   ;;  %s2461_s0 = inlined_call_operand.vmem [shape: f32[16,8,32], index: 0, kind: input, shape index: {}]   ;;  %s2462_s1 = inlined_call_operand.vmem [shape: f32[16,1,8], index: 1, kind: input, shape index: {}]   ;;  %s2463_s2 = inlined_call_operand.vmem [shape: f32[32,96], index: 2, kind: input, shape index: {}]   ;;  %s2464_s3 = inlined_call_operand.vmem [shape: f32[1,96], index: 3, kind: input, shape index: {}]   ;;  %s2465_s4 = inlined_call_operand.vmem [shape: f32[32,32], index: 4, kind: input, shape index: {}]   ;;  %s2466_s5 = inlined_call_operand.vmem [shape: f32[1,32], index: 5, kind: input, shape index: {}]   ;;  %s2467_s6 = inlined_call_operand.vmem [shape: f32[1,32], index: 6, kind: input, shape index: {}]   ;;  %s2468_s7 = inlined_call_operand.vmem [shape: f32[1,32], index: 7, kind: input, shape index: {}]   ;;  %s2469_s8 = inlined_call_operand.vmem [shape: f32[32,128], index: 8, kind: input, shape index: {}]   ;;  %s2470_s9 = inlined_call_operand.vmem [shape: f32[1,128], index: 9, kind: input, shape index: {}]   ;;  %s2471_s10 = inlined_call_operand.vmem [shape: f32[128,32], index: 10, kind: input, shape index: {}]   ;;  %s2472_s11 = inlined_call_operand.vmem [shape: f32[1,32], index: 11, kind: input, shape index: {}]   ;;  %s2473_s12 = inlined_call_operand.vmem [shape: f32[1,32], index: 12, kind: input, shape index: {}]   ;;  %s2474_s13 = inlined_call_operand.vmem [shape: f32[1,32], index: 13, kind: input, shape index: {}]   ;;  %s2475_s14 = inlined_call_operand.vmem [shape: f32[16,8,32], index: 14, kind: output, shape index: {}]  }
   0x1 LB: > { %s1854_s30 = sadd.s32 4294967295, %s2107_s29   ;;  %p1858_p0 = scmp.ge.s32.totalorder %s2107_s29, 1  ;;  %s2107_s29 = sphi %s2197_s29, %s24_s29  }
   0x2   : > { %p419_p1 = scmp.lt.s32.totalorder %s2107_s29, 17 }
   0x4   : > { %p420_p2 = pnand %p1858_p0, %p419_p1 }
   0x5   : > { %p466_p3 = scmp.lt.s32.totalorder (!%p420_p2), %s1854_s30, 15  ;;  %s2111_s15 = smov (!%p420_p2), 64  }
   0x6   : > { %423 = sbr.rel (%p420_p2) target bundleno = 4003 (0xfa3), region = 76  ;;  %s2112_s16 = smov (!%p420_p2), 96  }
   0x7   : > { %s2113_s17 = smov (!%p420_p2), 88   ;;  %s2114_s22 = smov (!%p420_p2), 120  }
   0x8   : > { %s2115_s25 = smov (!%p420_p2), 56   ;;  %s2117_s27 = smov (!%p420_p2), 112  }
   0x9   : > { %s2120_s18 = smov (!%p420_p2), 104  }
   0xb   : > { %v481_v0 = vld [vmem:[%s2463_s2 + $0x18] sm:$0xff]  ;;  %v2109_v1 = vmov 0.0   ;;  %v480_v2 = vld [vmem:[%s2463_s2 + $0x10] sm:$0xff]  ;;  %vm2110_vm0 = vmmov 0   ;;  %s2477_s30 = smov (!%p466_p3, %s1854_s30), 15  ;;  %v479_v3 = vld [vmem:[%s2463_s2 + $0x8] sm:$0xff] }
   0xc   : > { %1941 = vmatprep.subr.mxu0 %v2109_v1  ;;  %1949 = vmatprep.mubr.msk.f32.mxu0 %vm2110_vm0, %v2109_v1  ;;  %s1859_s21 = sshll.u32 %s2477_s30, 3  ;;  %v478_v4 = vld [vmem:[%s2463_s2] sm:$0xff]  ;;  %vm489_vm1 = vcmask 261120   ;;  %vm567_vm2 = vcmask 64512   ;;  %s472_s20 = scalar_lea.vmem %s2462_s1, %s2477_s30  ;;  %v905_v47 = vld [vmem:[%s2465_s4 + $0x8] sm:$0xff] }
   0xd   : > { %1942 = vmatpush3.msra.mxu0 %v481_v0  ;;  %1977 = vmatprep.subr.mxu1 %v2109_v1  ;;  %s469_s26 = scalar_lea.vmem %s2461_s0, %s1859_s21  ;;  %v1861_v6 = vld [vmem:[%s2464_s3] ss:$0 sm:$0xff] }
   0xe   : > { %1943 = vmatprep.subr.mxu0 %v2109_v1  ;;  %1979 = vmatprep.mubr.msk.f32.mxu1 %vm2110_vm0, %v2109_v1  ;;  %v2233_v5 = vld [vmem:[%s469_s26] sm:$0xff]  ;;  %s2116_s26 = smov 80  }
   0xf   : > { %1944 = vmatpush3.msra.mxu0 %v480_v2  ;;  %v2260_v13 = vld [vmem:[%s472_s20] ss:$0 sm:$0xff] }
  0x10   : > { %1945 = vmatprep.subr.mxu0 %v2109_v1  ;;  %v737_v28 = vld [vmem:[%s2465_s4] sm:$0xff] }
  0x11   : > { %1946 = vmatpush3.msra.mxu0 %v479_v3  ;;  %1978 = vmatpush3.msra.mxu1 %v737_v28 }
  0x12   : > { %1947 = vmatprep.subr.mxu0 %v2109_v1  ;;  %1987 = vmatprep.subr.mxu1 %v2109_v1 }
  0x13   : > { %1948 = vmatpush3.msra.mxu0 %v478_v4 }
  0x14   : > { %1950 = vmatmul.mubr.msk.f32.vlgmr.msra.gmra.mxu0 %vm489_vm1, %v2233_v5  ;;  %1952 = vmatprep.subr.mxu0 %v2109_v1 }
  0x15   : > { %1954 = vmatprep.mubr.msk.f32.mxu0 %vm2110_vm0, %v2109_v1 }
  0xd4   : > { %v559_v7 = vpop.f32.mrf.mxu0 }
  0xd5   : > { %v2244_v8 = vadd.f32 %v1861_v6, %v559_v7 }
  0xd6   : > { %v1951_v9 = vpop.f32.mrf.mxu0 }
  0xd7   : > { %661 = vrot.lane.b32.xlu1 %v2244_v8, %s2111_s15  ;;  %565 = vrot.lane.b32.xlu0 %v2244_v8, %s2112_s16  ;;  %s2118_s16 = smov 48   ;;  %v1219_v9 = vld [vmem:[%s2465_s4 + $0x10] sm:$0xff]  ;;  %s476_s15 = scalar_lea.vmem %s2475_s14, %s1859_s21 }
  0xdb   : > { %740 = vrot.lane.b32.xlu1 %v2244_v8, %s2113_s17  ;;  %s2119_s17 = smov 72  }
 0x149   : > { %v566_v10 = vpop.permute.xlu0 %565  ;;  %v662_v11 = vpop.permute.xlu1 %661 }
 0x14a   : > { %1953 = vmatpush3.xpose.msk.msra.mxu0 %vm567_vm2, %v566_v10 }
 0x14b   : > { %1957 = vmatprep.subr.mxu0 %v2109_v1 }
 0x14d   : > { %1955 = vmatmul.mubr.msk.f32.vlgmr.msra.gmra.mxu0 %vm567_vm2, %v2244_v8  ;;  %v741_v23 = vpop.permute.xlu1 %740 }
 0x14e   : > { %1958 = vmatpush3.msra.mxu0 %v662_v11  ;;  %1959 = vmatprep.mubr.msk.f32.mxu0 %vm2110_vm0, %v2109_v1 }
 0x14f   : > { %1962 = vmatprep.subr.mxu0 %v2109_v1 }
 0x20d   : > { %v638_v12 = vpop.f32.mrf.mxu0 }
 0x20e   : > { %v642_v14 = vmul.f32 0.35355338, %v638_v12 }
 0x20f   : > { %v1956_v15 = vpop.f32.mrf.mxu0 }
 0x210   : > { %v649_v16 = vadd.f32 %v2260_v13, %v642_v14 }
 0x212   : > { %v650_v17 = vsel %vm567_vm2, %v649_v16, -inf }
 0x213   : > { %651 = vmax.xlane.f32.xlu0 %v650_v17 }
 0x29c   : > { %v652_v18 = vpop.xlane.xlu0 %651 }
 0x29d   : > { %v653_v19 = vsub.f32 %v649_v16, %v652_v18 }
 0x29f   : > { %v654_v20 = vmul.f32 1.442695, %v653_v19 }
 0x2a1   : > { %2079 = vpow2.f32 %v654_v20 }
 0x2ae   : > { %v2080_v21 = vpop.eup %2079 }
 0x2af   : > { %v656_v22 = vsel %vm567_vm2, %v2080_v21, 0.0 }
 0x2b0   : > { %657 = vadd.xlane.f32.xlu1 %v656_v22 }
 0x2c1   : > { %738 = vrot.lane.b32.xlu1 %v2244_v8, %s2114_s22  ;;  %s2121_s22 = smov 40  }
 0x339   : > { %v658_v24 = vpop.xlane.xlu1 %657 }
 0x33a   : > { %2081 = vrcp.f32 %v658_v24 }
 0x33d   : > { %v739_v27 = vpop.permute.xlu1 %738 }
 0x347   : > { %v2082_v25 = vpop.eup %2081 }
 0x348   : > { %v660_v26 = vmul.f32 %v2082_v25, %v2080_v21 }
 0x34a   : > { %1960 = vmatmul.mubr.msk.f32.vlgmr.msra.gmra.mxu0 %vm567_vm2, %v660_v26 }
 0x34b   : > { %1963 = vmatpush3.xpose.msk.msra.mxu0 %vm567_vm2, %v741_v23  ;;  %1964 = vmatprep.mubr.msk.f32.mxu0 %vm2110_vm0, %v2109_v1 }
 0x34c   : > { %1967 = vmatprep.subr.mxu0 %v2109_v1 }
 0x34e   : > { %1965 = vmatmul.mubr.msk.f32.vlgmr.msra.gmra.mxu0 %vm567_vm2, %v739_v27 }
 0x34f   : > { %1969 = vmatprep.mubr.msk.f32.mxu0 %vm2110_vm0, %v2109_v1 }
 0x40a   : > { %v733_v29 = vpop.f32.mrf.mxu0 }
 0x40b   : > { %1980 = vmatmul.mubr.msk.f32.vlgmr.msra.gmra.mxu1 %vm567_vm2, %v733_v29 }
 0x40c   : > { %v1961_v30 = vpop.f32.mrf.mxu0  ;;  %1989 = vmatprep.mubr.msk.f32.mxu1 %vm2110_vm0, %v2109_v1 }
 0x40e   : > { %v812_v31 = vpop.f32.mrf.mxu0 }
 0x40f   : > { %v816_v32 = vmul.f32 0.35355338, %v812_v31 }
 0x410   : > { %v1966_v33 = vpop.f32.mrf.mxu0 }
 0x411   : > { %v817_v34 = vadd.f32 %v2260_v13, %v816_v32  ;;  %v1880_v33 = vld [vmem:[%s2466_s5] ss:$0 sm:$0xff] }
 0x413   : > { %v818_v35 = vsel %vm567_vm2, %v817_v34, -inf }
 0x414   : > { %819 = vmax.xlane.f32.xlu1 %v818_v35 }
 0x49d   : > { %v820_v36 = vpop.xlane.xlu1 %819 }
 0x49e   : > { %v821_v37 = vsub.f32 %v817_v34, %v820_v36 }
 0x4a0   : > { %v822_v38 = vmul.f32 1.442695, %v821_v37 }
 0x4a2   : > { %2083 = vpow2.f32 %v822_v38 }
 0x4af   : > { %v2084_v39 = vpop.eup %2083 }
 0x4b0   : > { %v824_v40 = vsel %vm567_vm2, %v2084_v39, 0.0 }
 0x4b1   : > { %825 = vadd.xlane.f32.xlu0 %v824_v40 }
 0x4c7   : > { %829 = vrot.lane.b32.xlu0 %v2244_v8, %s2115_s25 }
 0x4cb   : > { %v2285_v41 = vpop.f32.mrf.mxu1  ;;  %1054 = vrot.lane.b32.xlu0 %v2244_v8, %s2116_s26 }
 0x4cd   : > { %v1981_v42 = vpop.f32.mrf.mxu1 }
 0x4cf   : > { %1052 = vrot.lane.b32.xlu0 %v2244_v8, %s2117_s27 }
 0x53a   : > { %v826_v43 = vpop.xlane.xlu0 %825 }
 0x53b   : > { %2085 = vrcp.f32 %v826_v43 }
 0x53e   : > { %v830_v44 = vpop.permute.xlu0 %829 }
 0x53f   : > { %1968 = vmatpush3.msra.mxu0 %v830_v44  ;;  %v1578_v44 = vld [vmem:[%s2469_s8 + $0x18] sm:$0xff] }
 0x540   : > { %1972 = vmatprep.subr.mxu0 %v2109_v1 }
 0x542   : > { %v1055_v48 = vpop.permute.xlu0 %1054 }
 0x546   : > { %v1053_v51 = vpop.permute.xlu0 %1052 }
 0x548   : > { %v2086_v45 = vpop.eup %2085 }
 0x549   : > { %v828_v46 = vmul.f32 %v2086_v45, %v2084_v39  ;;  %v1577_v45 = vld [vmem:[%s2469_s8 + $0x10] sm:$0xff] }
 0x54b   : > { %1970 = vmatmul.mubr.msk.f32.vlgmr.msra.gmra.mxu0 %vm567_vm2, %v828_v46  ;;  %v1575_v46 = vld [vmem:[%s2469_s8] sm:$0xff] }
 0x54c   : > { %1973 = vmatpush3.msra.mxu0 %v905_v47  ;;  %1974 = vmatprep.mubr.msk.f32.mxu0 %vm2110_vm0, %v2109_v1 }
 0x54d   : > { %1982 = vmatprep.subr.mxu0 %v2109_v1 }
 0x60b   : > { %v901_v49 = vpop.f32.mrf.mxu0 }
 0x60c   : > { %1975 = vmatmul.mubr.msk.f32.vlgmr.msra.gmra.mxu0 %vm567_vm2, %v901_v49 }
 0x60d   : > { %1983 = vmatpush3.xpose.msk.msra.mxu0 %vm567_vm2, %v1055_v48  ;;  %v1971_v50 = vpop.f32.mrf.mxu0  ;;  %1984 = vmatprep.mubr.msk.f32.mxu0 %vm2110_vm0, %v2109_v1 }
 0x60e   : > { %1992 = vmatprep.subr.mxu0 %v2109_v1 }
 0x610   : > { %1985 = vmatmul.mubr.msk.f32.vlgmr.msra.gmra.mxu0 %vm567_vm2, %v1053_v51  ;;  %v1881_v51 = vld [vmem:[%s2467_s6] ss:$0 sm:$0xff] }
 0x611   : > { %1994 = vmatprep.mubr.msk.f32.mxu0 %vm2110_vm0, %v2109_v1  ;;  %1993 = vmatpush3.msra.mxu0 %v1219_v9  ;;  %v1669_v9 = vld [vmem:[%s2471_s10 + $0x8] sm:$0xff] }
 0x612   : > { %2002 = vmatprep.subr.mxu0 %v2109_v1 }
 0x6cc   : > { %v975_v52 = vpop.f32.mrf.mxu0 }
 0x6cd   : > { %v1049_v23 = vadd.f32 %v2285_v41, %v975_v52 }
 0x6ce   : > { %v1976_v53 = vpop.f32.mrf.mxu0 }
 0x6cf   : > { %v1882_v53 = vld [vmem:[%s2468_s7] ss:$0 sm:$0xff] }
 0x6d0   : > { %v1126_v54 = vpop.f32.mrf.mxu0 }
 0x6d1   : > { %v1130_v55 = vmul.f32 0.35355338, %v1126_v54 }
 0x6d2   : > { %v1986_v56 = vpop.f32.mrf.mxu0 }
 0x6d3   : > { %v1131_v57 = vadd.f32 %v2260_v13, %v1130_v55  ;;  %v1683_v56 = vld [vmem:[%s2471_s10 + $0x78] sm:$0xff] }
 0x6d5   : > { %v1132_v58 = vsel %vm567_vm2, %v1131_v57, -inf }
 0x6d6   : > { %1133 = vmax.xlane.f32.xlu1 %v1132_v58  ;;  %v1681_v58 = vld [vmem:[%s2471_s10 + $0x68] sm:$0xff] }
 0x6e7   : > { %1143 = vrot.lane.b32.xlu1 %v2244_v8, %s2118_s16 }
 0x6eb   : > { %1296 = vrot.lane.b32.xlu1 %v2244_v8, %s2119_s17 }
 0x6ef   : > { %1294 = vrot.lane.b32.xlu1 %v2244_v8, %s2120_s18 }
 0x75f   : > { %v1134_v59 = vpop.xlane.xlu1 %1133 }
 0x760   : > { %v1135_v60 = vsub.f32 %v1131_v57, %v1134_v59  ;;  %v1682_v57 = vld [vmem:[%s2471_s10 + $0x70] sm:$0xff]  ;;  %v1680_v59 = vld [vmem:[%s2471_s10 + $0x60] sm:$0xff] }
 0x762   : > { %v1136_v61 = vmul.f32 1.442695, %v1135_v60  ;;  %v1679_v60 = vld [vmem:[%s2471_s10 + $0x58] sm:$0xff] }
 0x763   : > { %v1144_v62 = vpop.permute.xlu1 %1143 }
 0x764   : > { %2087 = vpow2.f32 %v1136_v61  ;;  %1988 = vmatpush3.msra.mxu1 %v1144_v62  ;;  %v1678_v61 = vld [vmem:[%s2471_s10 + $0x50] sm:$0xff]  ;;  %v1677_v62 = vld [vmem:[%s2471_s10 + $0x48] sm:$0xff] }
 0x765   : > { %1997 = vmatprep.subr.mxu1 %v2109_v1 }
 0x767   : > { %v1297_v4 = vpop.permute.xlu1 %1296 }
 0x76b   : > { %v1295_v7 = vpop.permute.xlu1 %1294 }
 0x771   : > { %v2088_v63 = vpop.eup %2087 }
 0x772   : > { %v1138_v0 = vsel %vm567_vm2, %v2088_v63, 0.0 }
 0x773   : > { %1139 = vadd.xlane.f32.xlu0 %v1138_v0  ;;  %v1675_v0 = vld [vmem:[%s2471_s10 + $0x38] sm:$0xff] }
 0x7fc   : > { %v1140_v2 = vpop.xlane.xlu0 %1139 }
 0x7fd   : > { %2089 = vrcp.f32 %v1140_v2  ;;  %v1674_v2 = vld [vmem:[%s2471_s10 + $0x30] sm:$0xff] }
 0x80a   : > { %v2090_v3 = vpop.eup %2089 }
 0x80b   : > { %v1142_v6 = vmul.f32 %v2090_v3, %v2088_v63  ;;  %v1676_v63 = vld [vmem:[%s2471_s10 + $0x40] sm:$0xff]  ;;  %v1673_v3 = vld [vmem:[%s2471_s10 + $0x28] sm:$0xff] }
 0x80d   : > { %1990 = vmatmul.mubr.msk.f32.vlgmr.msra.gmra.mxu1 %vm567_vm2, %v1142_v6  ;;  %v1671_v6 = vld [vmem:[%s2471_s10 + $0x18] sm:$0xff] }
 0x80e   : > { %1998 = vmatpush3.xpose.msk.msra.mxu1 %vm567_vm2, %v1297_v4  ;;  %1999 = vmatprep.mubr.msk.f32.mxu1 %vm2110_vm0, %v2109_v1  ;;  %v1672_v4 = vld [vmem:[%s2471_s10 + $0x20] sm:$0xff] }
 0x80f   : > { %2007 = vmatprep.subr.mxu1 %v2109_v1 }
 0x811   : > { %2000 = vmatmul.mubr.msk.f32.vlgmr.msra.gmra.mxu1 %vm567_vm2, %v1295_v7  ;;  %v1670_v7 = vld [vmem:[%s2471_s10 + $0x10] sm:$0xff] }
 0x812   : > { %2009 = vmatprep.mubr.msk.f32.mxu1 %vm2110_vm0, %v2109_v1 }
 0x8cd   : > { %v1215_v10 = vpop.f32.mrf.mxu1 }
 0x8ce   : > { %1995 = vmatmul.mubr.msk.f32.vlgmr.msra.gmra.mxu0 %vm567_vm2, %v1215_v10  ;;  %v1668_v10 = vld [vmem:[%s2471_s10] sm:$0xff] }
 0x8cf   : > { %v1991_v11 = vpop.f32.mrf.mxu1  ;;  %2004 = vmatprep.mubr.msk.f32.mxu0 %vm2110_vm0, %v2109_v1 }
 0x8d0   : > { %v1883_v11 = vld [vmem:[%s2470_s9] ss:$0 sm:$0xff] }
 0x8d1   : > { %v1368_v12 = vpop.f32.mrf.mxu1 }
 0x8d2   : > { %v1372_v14 = vmul.f32 0.35355338, %v1368_v12 }
 0x8d3   : > { %v2001_v15 = vpop.f32.mrf.mxu1 }
 0x8d4   : > { %v1373_v16 = vadd.f32 %v2260_v13, %v1372_v14  ;;  %v1461_v13 = vld [vmem:[%s2465_s4 + $0x18] sm:$0xff] }
 0x8d5   : > { %2008 = vmatpush3.msra.mxu1 %v1461_v13 }
 0x8d6   : > { %v1374_v17 = vsel %vm567_vm2, %v1373_v16, -inf  ;;  %2023 = vmatprep.subr.mxu1 %v2109_v1 }
 0x8d7   : > { %1375 = vmax.xlane.f32.xlu1 %v1374_v17 }
 0x960   : > { %v1376_v18 = vpop.xlane.xlu1 %1375 }
 0x961   : > { %v1377_v19 = vsub.f32 %v1373_v16, %v1376_v18 }
 0x963   : > { %v1378_v20 = vmul.f32 1.442695, %v1377_v19 }
 0x965   : > { %2091 = vpow2.f32 %v1378_v20 }
 0x972   : > { %v2092_v21 = vpop.eup %2091 }
 0x973   : > { %v1380_v22 = vsel %vm567_vm2, %v2092_v21, 0.0 }
 0x974   : > { %1381 = vadd.xlane.f32.xlu0 %v1380_v22 }
 0x98a   : > { %1385 = vrot.lane.b32.xlu0 %v2244_v8, %s2121_s22 }
 0x98e   : > { %v1289_v24 = vpop.f32.mrf.mxu0 }
 0x98f   : > { %v1293_v25 = vadd.f32 %v1289_v24, %v1049_v23 }
 0x990   : > { %v1996_v26 = vpop.f32.mrf.mxu0 }
 0x9fd   : > { %v1382_v27 = vpop.xlane.xlu0 %1381 }
 0x9fe   : > { %2093 = vrcp.f32 %v1382_v27 }
 0xa01   : > { %v1386_v28 = vpop.permute.xlu0 %1385 }
 0xa02   : > { %2003 = vmatpush3.msra.mxu0 %v1386_v28 }
 0xa03   : > { %2012 = vmatprep.subr.mxu0 %v2109_v1 }
 0xa0b   : > { %v2094_v29 = vpop.eup %2093 }
 0xa0c   : > { %v1384_v8 = vmul.f32 %v2094_v29, %v2092_v21 }
 0xa0e   : > { %2005 = vmatmul.mubr.msk.f32.vlgmr.msra.gmra.mxu0 %vm567_vm2, %v1384_v8 }
 0xa0f   : > { %2020 = vmatprep.mubr.msk.f32.mxu0 %vm2110_vm0, %v2109_v1  ;;  %2013 = vmatpush3.msra.mxu0 %v1578_v44 }
 0xa10   : > { %2014 = vmatprep.subr.mxu0 %v2109_v1 }
 0xa11   : > { %2015 = vmatpush3.msra.mxu0 %v1577_v45 }
 0xa12   : > { %2016 = vmatprep.subr.mxu0 %v2109_v1 }
 0xace   : > { %v1457_v30 = vpop.f32.mrf.mxu0 }
 0xacf   : > { %2010 = vmatmul.mubr.msk.f32.vlgmr.msra.gmra.mxu1 %vm567_vm2, %v1457_v30 }
 0xad0   : > { %v2006_v31 = vpop.f32.mrf.mxu0  ;;  %2055 = vmatprep.mubr.msk.f32.mxu1 %vm2110_vm0, %v2109_v1  ;;  %2024 = vmatpush3.msra.mxu1 %v1683_v56 }
 0xad1   : > { %2025 = vmatprep.subr.mxu1 %v2109_v1 }
 0xad2   : > { %2026 = vmatpush3.msra.mxu1 %v1682_v57 }
 0xad3   : > { %2027 = vmatprep.subr.mxu1 %v2109_v1 }
 0xad4   : > { %2028 = vmatpush3.msra.mxu1 %v1681_v58 }
 0xad5   : > { %2029 = vmatprep.subr.mxu1 %v2109_v1 }
 0xad6   : > { %2030 = vmatpush3.msra.mxu1 %v1680_v59 }
 0xad7   : > { %2031 = vmatprep.subr.mxu1 %v2109_v1 }
 0xad8   : > { %2032 = vmatpush3.msra.mxu1 %v1679_v60 }
 0xad9   : > { %2033 = vmatprep.subr.mxu1 %v2109_v1 }
 0xada   : > { %2034 = vmatpush3.msra.mxu1 %v1678_v61 }
 0xadb   : > { %2035 = vmatprep.subr.mxu1 %v2109_v1 }
 0xadc   : > { %2036 = vmatpush3.msra.mxu1 %v1677_v62 }
 0xadd   : > { %2037 = vmatprep.subr.mxu1 %v2109_v1 }
 0xade   : > { %2038 = vmatpush3.msra.mxu1 %v1676_v63 }
 0xadf   : > { %2039 = vmatprep.subr.mxu1 %v2109_v1 }
 0xae0   : > { %2040 = vmatpush3.msra.mxu1 %v1675_v0 }
 0xae1   : > { %2041 = vmatprep.subr.mxu1 %v2109_v1 }
 0xae2   : > { %2042 = vmatpush3.msra.mxu1 %v1674_v2 }
 0xae3   : > { %2043 = vmatprep.subr.mxu1 %v2109_v1 }
 0xae4   : > { %2044 = vmatpush3.msra.mxu1 %v1673_v3 }
 0xae5   : > { %2045 = vmatprep.subr.mxu1 %v2109_v1 }
 0xae6   : > { %2046 = vmatpush3.msra.mxu1 %v1672_v4 }
 0xae7   : > { %2047 = vmatprep.subr.mxu1 %v2109_v1 }
 0xae8   : > { %2048 = vmatpush3.msra.mxu1 %v1671_v6 }
 0xae9   : > { %2049 = vmatprep.subr.mxu1 %v2109_v1 }
 0xaea   : > { %2050 = vmatpush3.msra.mxu1 %v1670_v7 }
 0xaeb   : > { %2051 = vmatprep.subr.mxu1 %v2109_v1 }
 0xaec   : > { %2052 = vmatpush3.msra.mxu1 %v1669_v9 }
 0xaed   : > { %2053 = vmatprep.subr.mxu1 %v2109_v1 }
 0xaee   : > { %2054 = vmatpush3.msra.mxu1 %v1668_v10 }
 0xb8f   : > { %v1531_v32 = vpop.f32.mrf.mxu1 }
 0xb90   : > { %v1535_v34 = vadd.f32 %v1531_v32, %v1293_v25 }
 0xb91   : > { %v2011_v35 = vpop.f32.mrf.mxu1 }
 0xb92   : > { %v1543_v36 = vadd.f32 %v1880_v33, %v1535_v34 }
 0xb94   : > { %v1544_v37 = vadd.f32 %v1543_v36, %v2233_v5  ;;  %v1576_v5 = vld [vmem:[%s2469_s8 + $0x8] sm:$0xff] }
 0xb95   : > { %2017 = vmatpush3.msra.mxu0 %v1576_v5 }
 0xb96   : > { %v1545_v38 = vsel %vm489_vm1, %v1544_v37, 0.0  ;;  %2018 = vmatprep.subr.mxu0 %v2109_v1  ;;  %v1885_v1 = vld [vmem:[%s2472_s11] ss:$0 sm:$0xff] }
 0xb97   : > { %1546 = vadd.xlane.f32.xlu0 %v1545_v38  ;;  %2019 = vmatpush3.msra.mxu0 %v1575_v46 }
 0xc20   : > { %v1547_v39 = vpop.xlane.xlu0 %1546 }
 0xc21   : > { %v1549_v40 = vmul.f32 0.03125, %v1547_v39  ;;  %v1887_v39 = vld [vmem:[%s2474_s13] ss:$0 sm:$0xff] }
 0xc23   : > { %v1550_v41 = vsub.f32 %v1544_v37, %v1549_v40  ;;  %v1886_v37 = vld [vmem:[%s2473_s12] ss:$0 sm:$0xff] }
 0xc25   : > { %v1551_v42 = vmul.f32 %v1550_v41, %v1550_v41 }
 0xc27   : > { %v1552_v43 = vsel %vm489_vm1, %v1551_v42, 0.0 }
 0xc28   : > { %1553 = vadd.xlane.f32.xlu1 %v1552_v43 }
 0xcb1   : > { %v1554_v47 = vpop.xlane.xlu1 %1553 }
 0xcb2   : > { %v1555_v48 = vmul.f32 0.03125, %v1554_v47 }
 0xcb4   : > { %v1556_v49 = vadd.f32 1e-12, %v1555_v48 }
 0xcb6   : > { %2095 = vrsqrt.f32 %v1556_v49 }
 0xcc3   : > { %v2096_v50 = vpop.eup %2095 }
 0xcc4   : > { %v1558_v52 = vmul.f32 %v2096_v50, %v1550_v41 }
 0xcc6   : > { %v1566_v54 = vmul.f32 %v1881_v51, %v1558_v52 }
 0xcc8   : > { %v2370_v55 = vadd.f32 %v1882_v53, %v1566_v54 }
 0xcca   : > { %2021 = vmatmul.mubr.msk.f32.vlgmr.msra.gmra.mxu0 %vm489_vm1, %v2370_v55 }
 0xd8a   : > { %v1655_v12 = vpop.f32.mrf.mxu0 }
 0xd8b   : > { %v1656_v14 = vadd.f32 %v1883_v11, %v1655_v12 }
 0xd8c   : > { %v2022_v15 = vpop.f32.mrf.mxu0 }
 0xd8d   : > { %v1660_v16 = vmul.f32 0.044715, %v1656_v14  ;;  %v1659_v22 = vmul.f32 0.5, %v1656_v14 }
 0xd8f   : > { %v1661_v17 = vmul.f32 %v1660_v16, %v1656_v14 }
 0xd91   : > { %v1662_v18 = vmul.f32 %v1661_v17, %v1656_v14 }
 0xd93   : > { %v1663_v19 = vadd.f32 %v1662_v18, %v1656_v14 }
 0xd95   : > { %v1664_v20 = vmul.f32 0.7978846, %v1663_v19 }
 0xd97   : > { %2097 = vtanh.f32 %v1664_v20 }
 0xda4   : > { %v2098_v21 = vpop.eup %2097 }
 0xda5   : > { %v1666_v23 = vadd.f32 1.0, %v2098_v21 }
 0xda7   : > { %v1667_v24 = vmul.f32 %v1666_v23, %v1659_v22 }
 0xda9   : > { %2056 = vmatmul.mubr.f32.vlgmr.msra.gmra.mxu1 %v1667_v24 }
 0xe69   : > { %v1757_v13 = vpop.f32.mrf.mxu1 }
 0xe6a   : > { %v1758_v25 = vadd.f32 %v1885_v1, %v1757_v13 }
 0xe6b   : > { %v2057_v26 = vpop.f32.mrf.mxu1 }
 0xe6c   : > { %v1761_v27 = vadd.f32 %v1758_v25, %v2370_v55 }
 0xe6e   : > { %v1762_v28 = vsel %vm489_vm1, %v1761_v27, 0.0 }
 0xe6f   : > { %1763 = vadd.xlane.f32.xlu1 %v1762_v28 }
 0xef8   : > { %v1764_v29 = vpop.xlane.xlu1 %1763 }
 0xef9   : > { %v1765_v8 = vmul.f32 0.03125, %v1764_v29 }
 0xefb   : > { %v1766_v30 = vsub.f32 %v1761_v27, %v1765_v8 }
 0xefd   : > { %v1767_v31 = vmul.f32 %v1766_v30, %v1766_v30 }
 0xeff   : > { %v1768_v32 = vsel %vm489_vm1, %v1767_v31, 0.0 }
 0xf00   : > { %1769 = vadd.xlane.f32.xlu1 %v1768_v32 }
 0xf89   : > { %v1770_v33 = vpop.xlane.xlu1 %1769 }
 0xf8a   : > { %v1771_v34 = vmul.f32 0.03125, %v1770_v33 }
 0xf8c   : > { %v1772_v35 = vadd.f32 1e-12, %v1771_v34 }
 0xf8e   : > { %2099 = vrsqrt.f32 %v1772_v35 }
 0xf9b   : > { %v2100_v36 = vpop.eup %2099 }
 0xf9c   : > { %v1774_v38 = vmul.f32 %v2100_v36, %v1766_v30 }
 0xf9e   : > { %v1782_v40 = vmul.f32 %v1886_v37, %v1774_v38 }
 0xfa0   : > { %v1790_v41 = vadd.f32 %v1887_v39, %v1782_v40 }
 0xfa2   : > { %1791 = vst.msk [vmem:[%s476_s15] sm:$0xff] %vm489_vm1, %v1790_v41 }
 0xfa3 PF: > { %s24_s29 = sadd.s32 1, %s2107_s29  }
 0xfa4   : > { %p21_p4 = scmp.ge.s32.totalorder %s24_s29, 18  }
 0xfa6   :  { %23 = sbr.rel (!%p21_p4) target bundleno = 1 (0x1), region = 109 }

// kernel: encoder_forward.8
= control target key start
LH: loop header
LB: loop body
LE: loop exit
PB: predicated region body
PF: predicated region fallthrough
CT: control target
= control target key end

     0   :  { %s569_s12 = smov 0   ;;  %s611_s0 = inlined_call_operand.vmem [shape: f32[4,3,32], index: 0, kind: input, shape index: {}]   ;;  %s612_s1 = inlined_call_operand.vmem [shape: f32[32,96], index: 1, kind: input, shape index: {}]   ;;  %s613_s2 = inlined_call_operand.vmem [shape: f32[1,96], index: 2, kind: input, shape index: {}]   ;;  %s614_s3 = inlined_call_operand.vmem [shape: f32[4,3,32], index: 3, kind: output, shape index: {}]  }
   0x1 LB: > { %s476_s13 = sadd.s32 4294967295, %s543_s12   ;;  %p480_p0 = scmp.ge.s32.totalorder %s543_s12, 1  ;;  %s543_s12 = sphi %s569_s12, %s13_s12  }
   0x2   : > { %p136_p1 = scmp.lt.s32.totalorder %s543_s12, 5 }
   0x4   : > { %p137_p2 = pnand %p480_p0, %p136_p1 }
   0x5   : > { %p158_p3 = scmp.lt.s32.totalorder (!%p137_p2), %s476_s13, 3  ;;  %s547_s28 = smov (!%p137_p2), 96  }
   0x6   : > { %140 = sbr.rel (%p137_p2) target bundleno = 1035 (0x40b), region = 32  ;;  %s548_s29 = smov (!%p137_p2), 64  }
   0xb   : > { %v170_v0 = vld [vmem:[%s612_s1 + $0x18] sm:$0xff]  ;;  %v545_v1 = vmov 0.0   ;;  %v169_v2 = vld [vmem:[%s612_s1 + $0x10] sm:$0xff]  ;;  %vm546_vm0 = vmmov 0   ;;  %s616_s13 = smov (!%p158_p3, %s476_s13), 3  ;;  %v168_v3 = vld [vmem:[%s612_s1 + $0x8] sm:$0xff] }
   0xc   : > { %500 = vmatprep.subr.mxu0 %v545_v1  ;;  %508 = vmatprep.mubr.msk.f32.mxu0 %vm546_vm0, %v545_v1  ;;  %s481_s20 = sshll.u32 %s616_s13, 2  ;;  %v167_v4 = vld [vmem:[%s612_s1] sm:$0xff]  ;;  %vm178_vm1 = vcmask 261120   ;;  %vm330_vm2 = vcmask 18432   ;;  %vm348_vm3 = vcmask 1042432   ;;  %vm344_vm4 = vcmask 23552  }
   0xd   : > { %501 = vmatpush3.msra.mxu0 %v170_v0  ;;  %511 = vmatprep.subr.mxu1 %v545_v1  ;;  %s161_s25 = scalar_lea.vmem %s611_s0, %s481_s20  ;;  %v483_v6 = vld [vmem:[%s613_s2] ss:$0 sm:$0xff]  ;;  %s165_s5 = scalar_lea.vmem %s614_s3, %s481_s20  ;;  %vm421_vm5 = vcmask 256000  }
   0xe   : > { %502 = vmatprep.subr.mxu0 %v545_v1  ;;  %513 = vmatprep.mubr.msk.f32.mxu1 %vm546_vm0, %v545_v1  ;;  %v166_v5 = vld [vmem:[%s161_s25] sm:$0x7] }
   0xf   : > { %503 = vmatpush3.msra.mxu0 %v169_v2 }
  0x10   : > { %504 = vmatprep.subr.mxu0 %v545_v1 }
  0x11   : > { %505 = vmatpush3.msra.mxu0 %v168_v3 }
  0x12   : > { %506 = vmatprep.subr.mxu0 %v545_v1 }
  0x13   : > { %507 = vmatpush3.msra.mxu0 %v167_v4 }
  0x14   : > { %509 = vmatmul.mubr.msk.f32.vlgmr.msra.gmra.mxu0 %vm178_vm1, %v166_v5 }
  0xd4   : > { %v248_v7 = vpop.f32.mrf.mxu0 }
  0xd5   : > { %v249_v8 = vadd.f32 %v483_v6, %v248_v7 }
  0xd6   : > { %v510_v9 = vpop.f32.mrf.mxu0 }
  0xd7   : > { %253 = vrot.lane.b32.xlu0 %v249_v8, %s547_s28 }
 0x149   : > { %v254_v10 = vpop.permute.xlu0 %253 }
 0x14a   : > { %512 = vmatpush3.xpose.msk.msra.mxu1 %vm178_vm1, %v254_v10 }
 0x14b   : > { %516 = vmatprep.subr.mxu1 %v545_v1 }
 0x14d   : > { %514 = vmatmul.mubr.msk.f32.vlgmr.msra.gmra.mxu1 %vm178_vm1, %v249_v8 }
 0x14e   : > { %518 = vmatprep.mubr.msk.f32.mxu1 %vm546_vm0, %v545_v1 }
 0x20d   : > { %v325_v11 = vpop.f32.mrf.mxu1 }
 0x20e   : > { %v329_v12 = vmul.f32 0.17677669, %v325_v11 }
 0x20f   : > { %v515_v13 = vpop.f32.mrf.mxu1 }
 0x210   : > { %v331_v14 = vsel %vm330_vm2, %v329_v12, -inf }
 0x211   : > { %332 = vmax.xlane.f32.xlu0 %v331_v14 }
 0x29a   : > { %v333_v15 = vpop.xlane.xlu0 %332 }
 0x29b   : > { %v334_v16 = vsub.f32 %v329_v12, %v333_v15 }
 0x29d   : > { %v335_v17 = vmul.f32 1.442695, %v334_v16 }
 0x29f   : > { %533 = vpow2.f32 %v335_v17 }
 0x2ac   : > { %v534_v18 = vpop.eup %533 }
 0x2ad   : > { %v337_v19 = vsel %vm330_vm2, %v534_v18, 0.0 }
 0x2ae   : > { %338 = vadd.xlane.f32.xlu1 %v337_v19 }
 0x2bf   : > { %342 = vrot.lane.b32.xlu1 %v249_v8, %s548_s29 }
 0x337   : > { %v339_v20 = vpop.xlane.xlu1 %338 }
 0x338   : > { %535 = vrcp.f32 %v339_v20 }
 0x33b   : > { %v343_v21 = vpop.permute.xlu1 %342 }
 0x33c   : > { %517 = vmatpush3.msk.msra.mxu1 %vm348_vm3, %v343_v21 }
 0x345   : > { %v536_v22 = vpop.eup %535 }
 0x346   : > { %v341_v23 = vmul.f32 %v536_v22, %v534_v18 }
 0x348   : > { %519 = vmatmul.mubr.msk.f32.vlgmr.msra.gmra.mxu1 %vm344_vm4, %v341_v23 }
 0x408   : > { %v417_v24 = vpop.f32.mrf.mxu1 }
 0x409   : > { %422 = vst.msk [vmem:[%s165_s5] sm:$0x7] %vm421_vm5, %v417_v24 }
 0x40a   : > { %v520_v25 = vpop.f32.mrf.mxu1 }
 0x40b PF: > { %s13_s12 = sadd.s32 1, %s543_s12  }
 0x40c   : > { %p10_p4 = scmp.ge.s32.totalorder %s13_s12, 6  }
 0x40e   :  { %12 = sbr.rel (!%p10_p4) target bundleno = 1 (0x1), region = 62 }

</bundles_post_ra>
